<compile_context>
chip_gen: v7x
topology: tpu7x:2x2x1
jax: 0.10.0
libtpu: 0.0.40
codegen_flags: <defaults>
</compile_context>

<pallas_src>
import jax
import jax.numpy as jnp
import numpy as np
from jax.experimental import pallas as pl
from jax.experimental.pallas import tpu as pltpu


# ----------------------------------------------------------------------------
# Pallas kernel: full stacked-LSTM (2 layers, layer-skewed) + FC head in VMEM.
# ----------------------------------------------------------------------------
def _decoder_kernel(x_ref, hin_ref, cin_ref,
                    wih0_ref, b0_ref,
                    wc_ref, b1_ref,
                    wfc_ref, bfc_ref,
                    pred_ref, hn_ref, cn_ref,
                    x0_scr, h1_scr):
    TB = x_ref.shape[0]                 # T * BP (time-major, flattened)
    BP = hin_ref.shape[1]               # padded batch (sublane-aligned, 8)
    H = hin_ref.shape[2]
    T = TB // BP
    H3 = 3 * H
    H4 = 4 * H

    # Bulk layer-0 input projection: one MXU matmul for all timesteps, parked
    # in VMEM scratch so per-step reads don't pin vregs across the unrolled
    # body (vld slots refetch them for free).
    x0_scr[...] = (jnp.dot(x_ref[...], wih0_ref[...],
                           preferred_element_type=jnp.float32)
                   + b0_ref[...])

    # Layer-1 bias broadcast exactly once (JAX does not CSE broadcast_in_dim).
    b1 = jnp.broadcast_to(b1_ref[...], (BP, H4))

    def sigmoid_t(v):
        # sigmoid(x) = 0.5*tanh(0.5*x) + 0.5 : a single EUP transcendental.
        return 0.5 * jnp.tanh(0.5 * v) + 0.5

    def cell_update(g, c):
        # Gate columns are pre-permuted to (i, f, o | g):
        # one sigmoid slab over 3H lanes + one tanh over H lanes.
        s = sigmoid_t(g[:, :H3])
        i = s[:, 0:H]
        f = s[:, H:2 * H]
        o = s[:, 2 * H:H3]
        gg = jnp.tanh(g[:, H3:H4])
        c_new = f * c + i * gg
        h_new = o * jnp.tanh(c_new)
        return h_new, c_new

    # Loop-carried state lives purely in vregs.
    h0 = hin_ref[0]
    c0 = cin_ref[0]
    h1 = hin_ref[1]
    c1 = cin_ref[1]

    def fused_mm(a, b):
        # Single (BP, 2H) x (2H, 8H) matmul; 4H = 128 so the two result halves
        # split on a clean 128-lane boundary.
        return jnp.dot(jnp.concatenate([a, b], axis=1), wc_ref[...],
                       preferred_element_type=jnp.float32)

    # --- prologue: layer-0 step 0 (layer-1 half of the result is unused). ---
    r = fused_mm(h0, h1)
    h0, c0 = cell_update(x0_scr[0:BP, :] + r[:, 0:H4], c0)

    # --- main skewed loop: layer-1 @ step t  +  layer-0 @ step t+1. ---------
    for t in range(T - 1):               # T is small & static: full unroll.
        r = fused_mm(h0, h1)             # LHS = [h0(t) | h1(t-1)]
        # layer 1, step t
        h1, c1 = cell_update(r[:, H4:] + b1, c1)
        h1_scr[t * BP:(t + 1) * BP, :] = h1
        # layer 0, step t+1  (independent of the layer-1 update above)
        h0, c0 = cell_update(x0_scr[(t + 1) * BP:(t + 2) * BP, :] + r[:, 0:H4],
                             c0)

    # --- epilogue: layer-1 step T-1 (layer-0 half of the result unused). ----
    r = fused_mm(h0, h1)
    h1, c1 = cell_update(r[:, H4:] + b1, c1)
    h1_scr[(T - 1) * BP:T * BP, :] = h1

    # Final states: single aligned write each.
    hn_ref[0] = h0
    hn_ref[1] = h1
    cn_ref[0] = c0
    cn_ref[1] = c1

    # FC head hoisted out of the recurrence: one bulk matmul + one lane-dense
    # (output padded to a multiple of 128 lanes) bulk store.
    pred_ref[...] = (jnp.dot(h1_scr[...], wfc_ref[...],
                             preferred_element_type=jnp.float32)
                     + bfc_ref[...])


# ----------------------------------------------------------------------------
# Wrapper: PyTorch-like (batch_first) interface around the Pallas kernel.
# ----------------------------------------------------------------------------
def decoder_forward(x, hn, cn, params):
    """x: (B, T, input_size); hn, cn: (num_layers=2, B, H)."""
    wih0, whh0, b0, wih1, whh1, b1, wfc, bfc = params
    B, T, I = x.shape
    L, _, H = hn.shape
    O = wfc.shape[1]
    assert L == 2, "kernel is specialized for num_layers=2"

    BP = 8                                    # sublane-aligned batch
    OP = ((O + 127) // 128) * 128             # lane-dense FC output width

    # Permute gate columns from PyTorch order (i, f, g, o) to (i, f, o | g).
    perm = jnp.concatenate([jnp.arange(0, H), jnp.arange(H, 2 * H),
                            jnp.arange(3 * H, 4 * H), jnp.arange(2 * H, 3 * H)])

    def pg(w):
        return w[..., perm]

    wih0_p, b0_p = pg(wih0), pg(b0)
    whh0_p, wih1_p, whh1_p, b1_p = pg(whh0), pg(wih1), pg(whh1), pg(b1)

    # Fused recurrent weight (2H, 8H): [[Whh0 | Wih1], [0 | Whh1]].
    wc = jnp.concatenate([
        jnp.concatenate([whh0_p, wih1_p], axis=1),
        jnp.concatenate([jnp.zeros((H, 4 * H), jnp.float32), whh1_p], axis=1),
    ], axis=0)

    # Pad batch to BP and flatten time-major so every per-step slice is an
    # aligned (8, lanes) block.
    x_p = jnp.zeros((BP, T, I), x.dtype).at[:B].set(x)
    x_flat = jnp.transpose(x_p, (1, 0, 2)).reshape(T * BP, I)
    hn_p = jnp.zeros((L, BP, H), hn.dtype).at[:, :B].set(hn)
    cn_p = jnp.zeros((L, BP, H), cn.dtype).at[:, :B].set(cn)

    # Lane-dense FC head (zero-padded columns are sliced away below).
    wfc_p = jnp.zeros((H, OP), wfc.dtype).at[:, :O].set(wfc)
    bfc_p = jnp.zeros((1, OP), bfc.dtype).at[:, :O].set(bfc)

    vmem = pl.BlockSpec(memory_space=pltpu.MemorySpace.VMEM)
    pred_flat, hn_out, cn_out = pl.pallas_call(
        _decoder_kernel,
        out_shape=(
            jax.ShapeDtypeStruct((T * BP, OP), jnp.float32),
            jax.ShapeDtypeStruct((L, BP, H), jnp.float32),
            jax.ShapeDtypeStruct((L, BP, H), jnp.float32),
        ),
        in_specs=[vmem] * 9,
        out_specs=(vmem, vmem, vmem),
        scratch_shapes=[
            pltpu.VMEM((T * BP, 4 * H), jnp.float32),   # hoisted x@Wih0 + b0
            pltpu.VMEM((T * BP, H), jnp.float32),       # per-step h1 outputs
        ],
    )(x_flat, hn_p, cn_p, wih0_p, b0_p, wc, b1_p, wfc_p, bfc_p)

    pred = pred_flat.reshape(T, BP, OP)[:, :B, :O].transpose(1, 0, 2)
    return pred, hn_out[:, :B], cn_out[:, :B]


# ----------------------------------------------------------------------------
# Pure-JAX reference (PyTorch gate order, no Pallas) for correctness check.
# ----------------------------------------------------------------------------
def decoder_reference(x, hn, cn, params):
    wih0, whh0, b0, wih1, whh1, b1, wfc, bfc = params
    H = whh0.shape[0]
    hi = jax.lax.Precision.HIGHEST

    def cell(x_t, h, c, wih, whh, b):
        g = (jnp.dot(x_t, wih, precision=hi)
             + jnp.dot(h, whh, precision=hi) + b)
        i = jax.nn.sigmoid(g[:, :H])
        f = jax.nn.sigmoid(g[:, H:2 * H])
        gg = jnp.tanh(g[:, 2 * H:3 * H])
        o = jax.nn.sigmoid(g[:, 3 * H:])
        c = f * c + i * gg
        h = o * jnp.tanh(c)
        return h, c

    h0, c0, h1, c1 = hn[0], cn[0], hn[1], cn[1]
    preds = []
    for t in range(x.shape[1]):
        h0, c0 = cell(x[:, t], h0, c0, wih0, whh0, b0)
        h1, c1 = cell(h0, h1, c1, wih1, whh1, b1)
        preds.append(jnp.dot(h1, wfc, precision=hi) + bfc)
    return (jnp.stack(preds, axis=1),
            jnp.stack([h0, h1]),
            jnp.stack([c0, c1]))


# ----------------------------------------------------------------------------
# Deterministic parameter init (PyTorch-style uniform(-1/sqrt(H), 1/sqrt(H))).
# ----------------------------------------------------------------------------
def init_params(key, input_size, hidden_size, output_size):
    H, I, O = hidden_size, input_size, output_size
    k = 1.0 / np.sqrt(H)
    keys = jax.random.split(key, 8)

    def u(kk, shape):
        return jax.random.uniform(kk, shape, jnp.float32, -k, k)

    wih0 = u(keys[0], (I, 4 * H))            # layer 0 input->gates (transposed)
    whh0 = u(keys[1], (H, 4 * H))            # layer 0 hidden->gates
    b0 = u(keys[2], (1, 4 * H)) + u(keys[3], (1, 4 * H))   # b_ih + b_hh
    wih1 = u(keys[4], (H, 4 * H))            # layer 1 input->gates
    whh1 = u(keys[5], (H, 4 * H))
    b1 = u(keys[6], (1, 4 * H)) + u(keys[7], (1, 4 * H))
    kfc_w, kfc_b = jax.random.split(jax.random.fold_in(key, 123))
    wfc = jax.random.uniform(kfc_w, (H, O), jnp.float32, -k, k)
    bfc = jax.random.uniform(kfc_b, (1, O), jnp.float32, -k, k)
    return (wih0, whh0, b0, wih1, whh1, b1, wfc, bfc)


if __name__ == "__main__":
    # Small shapes consistent with the module (2-layer LSTM, batch_first;
    # FC: hidden->output).  4H = 128 is exactly one vreg of lanes.
    INPUT_SIZE, HIDDEN_SIZE, OUTPUT_SIZE, NUM_LAYERS = 16, 32, 64, 2
    B, T = 2, 8

    root = jax.random.PRNGKey(0)
    kp, kx, kh, kc = jax.random.split(root, 4)
    params = init_params(kp, INPUT_SIZE, HIDDEN_SIZE, OUTPUT_SIZE)

    x = jax.random.normal(kx, (B, T, INPUT_SIZE), jnp.float32)
    hn = jax.random.normal(kh, (NUM_LAYERS, B, HIDDEN_SIZE), jnp.float32)
    cn = jax.random.normal(kc, (NUM_LAYERS, B, HIDDEN_SIZE), jnp.float32)

    pred, hn_out, cn_out = decoder_forward(x, hn, cn, params)
    jax.block_until_ready((pred, hn_out, cn_out))

    # Sanity-check against a pure-JAX reference of the same math.  Tolerance
    # tightened to 1e-4 (f32 in / f32 acc): tight enough to catch any
    # gate-permutation or layer-skew bug, loose enough for MXU-pass /
    # transcendental-approximation differences vs the XLA path.
    pred_r, hn_r, cn_r = decoder_reference(x, hn, cn, params)
    np.testing.assert_allclose(np.asarray(pred), np.asarray(pred_r),
                               rtol=1e-4, atol=1e-4)
    np.testing.assert_allclose(np.asarray(hn_out), np.asarray(hn_r),
                               rtol=1e-4, atol=1e-4)
    np.testing.assert_allclose(np.asarray(cn_out), np.asarray(cn_r),
                               rtol=1e-4, atol=1e-4)

    assert pred.shape == (B, T, OUTPUT_SIZE)
    assert hn_out.shape == (NUM_LAYERS, B, HIDDEN_SIZE)
    assert cn_out.shape == (NUM_LAYERS, B, HIDDEN_SIZE)
    print("KERNEL_OK")
</pallas_src>

<mosaic_0001>
module attributes {stable_mosaic.version = 11 : i64} {
  func.func @_decoder_kernel(%arg0: memref<64x16xf32, #tpu.memory_space<vmem>>, %arg1: memref<2x8x32xf32, #tpu.memory_space<vmem>>, %arg2: memref<2x8x32xf32, #tpu.memory_space<vmem>>, %arg3: memref<16x128xf32, #tpu.memory_space<vmem>>, %arg4: memref<1x128xf32, #tpu.memory_space<vmem>>, %arg5: memref<64x256xf32, #tpu.memory_space<vmem>>, %arg6: memref<1x128xf32, #tpu.memory_space<vmem>>, %arg7: memref<32x128xf32, #tpu.memory_space<vmem>>, %arg8: memref<1x128xf32, #tpu.memory_space<vmem>>, %arg9: memref<64x128xf32, #tpu.memory_space<vmem>>, %arg10: memref<2x8x32xf32, #tpu.memory_space<vmem>>, %arg11: memref<2x8x32xf32, #tpu.memory_space<vmem>>, %arg12: memref<64x128xf32, #tpu.memory_space<vmem>>, %arg13: memref<64x32xf32, #tpu.memory_space<vmem>>) attributes {dimension_semantics = [], scalar_prefetch = 0 : i64, scratch_operands = 2 : i64, tpu.core_type = #tpu.core_type<tc>} {
    %c0 = arith.constant 0 : index
    %c0_0 = arith.constant 0 : index
    %0 = vector.load %arg0[%c0, %c0_0] : memref<64x16xf32, #tpu.memory_space<vmem>>, vector<64x16xf32>
    %c0_1 = arith.constant 0 : index
    %c0_2 = arith.constant 0 : index
    %1 = vector.load %arg3[%c0_1, %c0_2] : memref<16x128xf32, #tpu.memory_space<vmem>>, vector<16x128xf32>
    %cst = arith.constant dense<0.000000e+00> : vector<64x128xf32>
    %2 = tpu.matmul %0, %1, %cst {dimension_numbers = #tpu.dot_dimension_numbers<[1], [0], [0], [1], [0, 0, 1, 1], [], []>} : vector<64x16xf32>, vector<16x128xf32>, vector<64x128xf32> -> vector<64x128xf32>
    %c0_3 = arith.constant 0 : index
    %c0_4 = arith.constant 0 : index
    %3 = vector.load %arg4[%c0_3, %c0_4] : memref<1x128xf32, #tpu.memory_space<vmem>>, vector<1x128xf32>
    %4 = vector.broadcast %3 : vector<1x128xf32> to vector<64x128xf32>
    %5 = arith.addf %2, %4 : vector<64x128xf32>
    %c0_5 = arith.constant 0 : index
    %c0_6 = arith.constant 0 : index
    %6 = vector.load %arg12[%c0_5, %c0_6] : memref<64x128xf32, #tpu.memory_space<vmem>>, vector<64x128xf32>
    tpu.vector_store %arg12[%c0_5, %c0_6], %5 {strides = array<i32>} : memref<64x128xf32, #tpu.memory_space<vmem>>, vector<64x128xf32>,
    %c0_7 = arith.constant 0 : index
    %c0_8 = arith.constant 0 : index
    %7 = vector.load %arg6[%c0_7, %c0_8] : memref<1x128xf32, #tpu.memory_space<vmem>>, vector<1x128xf32>
    %8 = vector.shape_cast %7 : vector<1x128xf32> to vector<1x128xf32>
    %9 = vector.broadcast %8 : vector<1x128xf32> to vector<8x128xf32>
    %c0_9 = arith.constant 0 : index
    %c0_10 = arith.constant 0 : index
    %c0_11 = arith.constant 0 : index
    %10 = vector.load %arg1[%c0_9, %c0_10, %c0_11] : memref<2x8x32xf32, #tpu.memory_space<vmem>>, vector<1x8x32xf32>
    %11 = vector.shape_cast %10 : vector<1x8x32xf32> to vector<8x32xf32>
    %c0_12 = arith.constant 0 : index
    %c0_13 = arith.constant 0 : index
    %c0_14 = arith.constant 0 : index
    %12 = vector.load %arg2[%c0_12, %c0_13, %c0_14] : memref<2x8x32xf32, #tpu.memory_space<vmem>>, vector<1x8x32xf32>
    %13 = vector.shape_cast %12 : vector<1x8x32xf32> to vector<8x32xf32>
    %c1 = arith.constant 1 : index
    %c0_15 = arith.constant 0 : index
    %c0_16 = arith.constant 0 : index
    %14 = vector.load %arg1[%c1, %c0_15, %c0_16] : memref<2x8x32xf32, #tpu.memory_space<vmem>>, vector<1x8x32xf32>
    %15 = vector.shape_cast %14 : vector<1x8x32xf32> to vector<8x32xf32>
    %c1_17 = arith.constant 1 : index
    %c0_18 = arith.constant 0 : index
    %c0_19 = arith.constant 0 : index
    %16 = vector.load %arg2[%c1_17, %c0_18, %c0_19] : memref<2x8x32xf32, #tpu.memory_space<vmem>>, vector<1x8x32xf32>
    %17 = vector.shape_cast %16 : vector<1x8x32xf32> to vector<8x32xf32>
    %18 = tpu.concatenate %11, %15 in 1 : vector<8x32xf32>, vector<8x32xf32> -> vector<8x64xf32>
    %c0_20 = arith.constant 0 : index
    %c0_21 = arith.constant 0 : index
    %19 = vector.load %arg5[%c0_20, %c0_21] : memref<64x256xf32, #tpu.memory_space<vmem>>, vector<64x256xf32>
    %cst_22 = arith.constant dense<0.000000e+00> : vector<8x256xf32>
    %20 = tpu.matmul %18, %19, %cst_22 {dimension_numbers = #tpu.dot_dimension_numbers<[1], [0], [0], [1], [0, 0, 1, 1], [], []>} : vector<8x64xf32>, vector<64x256xf32>, vector<8x256xf32> -> vector<8x256xf32>
    %c0_23 = arith.constant 0 : index
    %c0_24 = arith.constant 0 : index
    %21 = vector.load %arg12[%c0_23, %c0_24] : memref<64x128xf32, #tpu.memory_space<vmem>>, vector<8x128xf32>
    %22 = vector.extract_strided_slice %20 {offsets = [0, 0], sizes = [8, 128], strides = [1, 1]} : vector<8x256xf32> to vector<8x128xf32>
    %23 = arith.addf %21, %22 : vector<8x128xf32>
    %24 = vector.extract_strided_slice %23 {offsets = [0, 0], sizes = [8, 96], strides = [1, 1]} : vector<8x128xf32> to vector<8x96xf32>
    %cst_25 = arith.constant 5.000000e-01 : f32
    %25 = vector.broadcast %cst_25 : f32 to vector<8x96xf32>
    %26 = arith.mulf %25, %24 : vector<8x96xf32>
    %27 = math.tanh %26 : vector<8x96xf32>
    %cst_26 = arith.constant 5.000000e-01 : f32
    %28 = vector.broadcast %cst_26 : f32 to vector<8x96xf32>
    %29 = arith.mulf %28, %27 : vector<8x96xf32>
    %cst_27 = arith.constant 5.000000e-01 : f32
    %30 = vector.broadcast %cst_27 : f32 to vector<8x96xf32>
    %31 = arith.addf %29, %30 : vector<8x96xf32>
    %32 = vector.extract_strided_slice %31 {offsets = [0, 0], sizes = [8, 32], strides = [1, 1]} : vector<8x96xf32> to vector<8x32xf32>
    %33 = vector.extract_strided_slice %31 {offsets = [0, 32], sizes = [8, 32], strides = [1, 1]} : vector<8x96xf32> to vector<8x32xf32>
    %34 = vector.extract_strided_slice %31 {offsets = [0, 64], sizes = [8, 32], strides = [1, 1]} : vector<8x96xf32> to vector<8x32xf32>
    %35 = vector.extract_strided_slice %23 {offsets = [0, 96], sizes = [8, 32], strides = [1, 1]} : vector<8x128xf32> to vector<8x32xf32>
    %36 = math.tanh %35 : vector<8x32xf32>
    %37 = arith.mulf %33, %13 : vector<8x32xf32>
    %38 = arith.mulf %32, %36 : vector<8x32xf32>
    %39 = arith.addf %37, %38 : vector<8x32xf32>
    %40 = math.tanh %39 : vector<8x32xf32>
    %41 = arith.mulf %34, %40 : vector<8x32xf32>
    %42 = tpu.concatenate %41, %15 in 1 : vector<8x32xf32>, vector<8x32xf32> -> vector<8x64xf32>
    %c0_28 = arith.constant 0 : index
    %c0_29 = arith.constant 0 : index
    %43 = vector.load %arg5[%c0_28, %c0_29] : memref<64x256xf32, #tpu.memory_space<vmem>>, vector<64x256xf32>
    %cst_30 = arith.constant dense<0.000000e+00> : vector<8x256xf32>
    %44 = tpu.matmul %42, %43, %cst_30 {dimension_numbers = #tpu.dot_dimension_numbers<[1], [0], [0], [1], [0, 0, 1, 1], [], []>} : vector<8x64xf32>, vector<64x256xf32>, vector<8x256xf32> -> vector<8x256xf32>
    %45 = vector.extract_strided_slice %44 {offsets = [0, 128], sizes = [8, 128], strides = [1, 1]} : vector<8x256xf32> to vector<8x128xf32>
    %46 = arith.addf %45, %9 : vector<8x128xf32>
    %47 = vector.extract_strided_slice %46 {offsets = [0, 0], sizes = [8, 96], strides = [1, 1]} : vector<8x128xf32> to vector<8x96xf32>
    %cst_31 = arith.constant 5.000000e-01 : f32
    %48 = vector.broadcast %cst_31 : f32 to vector<8x96xf32>
    %49 = arith.mulf %48, %47 : vector<8x96xf32>
    %50 = math.tanh %49 : vector<8x96xf32>
    %cst_32 = arith.constant 5.000000e-01 : f32
    %51 = vector.broadcast %cst_32 : f32 to vector<8x96xf32>
    %52 = arith.mulf %51, %50 : vector<8x96xf32>
    %cst_33 = arith.constant 5.000000e-01 : f32
    %53 = vector.broadcast %cst_33 : f32 to vector<8x96xf32>
    %54 = arith.addf %52, %53 : vector<8x96xf32>
    %55 = vector.extract_strided_slice %54 {offsets = [0, 0], sizes = [8, 32], strides = [1, 1]} : vector<8x96xf32> to vector<8x32xf32>
    %56 = vector.extract_strided_slice %54 {offsets = [0, 32], sizes = [8, 32], strides = [1, 1]} : vector<8x96xf32> to vector<8x32xf32>
    %57 = vector.extract_strided_slice %54 {offsets = [0, 64], sizes = [8, 32], strides = [1, 1]} : vector<8x96xf32> to vector<8x32xf32>
    %58 = vector.extract_strided_slice %46 {offsets = [0, 96], sizes = [8, 32], strides = [1, 1]} : vector<8x128xf32> to vector<8x32xf32>
    %59 = math.tanh %58 : vector<8x32xf32>
    %60 = arith.mulf %56, %17 : vector<8x32xf32>
    %61 = arith.mulf %55, %59 : vector<8x32xf32>
    %62 = arith.addf %60, %61 : vector<8x32xf32>
    %63 = math.tanh %62 : vector<8x32xf32>
    %64 = arith.mulf %57, %63 : vector<8x32xf32>
    %c0_34 = arith.constant 0 : index
    %c0_35 = arith.constant 0 : index
    %65 = vector.load %arg13[%c0_34, %c0_35] : memref<64x32xf32, #tpu.memory_space<vmem>>, vector<8x32xf32>
    tpu.vector_store %arg13[%c0_34, %c0_35], %64 {strides = array<i32>} : memref<64x32xf32, #tpu.memory_space<vmem>>, vector<8x32xf32>,
    %c8 = arith.constant 8 : index
    %c0_36 = arith.constant 0 : index
    %66 = vector.load %arg12[%c8, %c0_36] : memref<64x128xf32, #tpu.memory_space<vmem>>, vector<8x128xf32>
    %67 = vector.extract_strided_slice %44 {offsets = [0, 0], sizes = [8, 128], strides = [1, 1]} : vector<8x256xf32> to vector<8x128xf32>
    %68 = arith.addf %66, %67 : vector<8x128xf32>
    %69 = vector.extract_strided_slice %68 {offsets = [0, 0], sizes = [8, 96], strides = [1, 1]} : vector<8x128xf32> to vector<8x96xf32>
    %cst_37 = arith.constant 5.000000e-01 : f32
    %70 = vector.broadcast %cst_37 : f32 to vector<8x96xf32>
    %71 = arith.mulf %70, %69 : vector<8x96xf32>
    %72 = math.tanh %71 : vector<8x96xf32>
    %cst_38 = arith.constant 5.000000e-01 : f32
    %73 = vector.broadcast %cst_38 : f32 to vector<8x96xf32>
    %74 = arith.mulf %73, %72 : vector<8x96xf32>
    %cst_39 = arith.constant 5.000000e-01 : f32
    %75 = vector.broadcast %cst_39 : f32 to vector<8x96xf32>
    %76 = arith.addf %74, %75 : vector<8x96xf32>
    %77 = vector.extract_strided_slice %76 {offsets = [0, 0], sizes = [8, 32], strides = [1, 1]} : vector<8x96xf32> to vector<8x32xf32>
    %78 = vector.extract_strided_slice %76 {offsets = [0, 32], sizes = [8, 32], strides = [1, 1]} : vector<8x96xf32> to vector<8x32xf32>
    %79 = vector.extract_strided_slice %76 {offsets = [0, 64], sizes = [8, 32], strides = [1, 1]} : vector<8x96xf32> to vector<8x32xf32>
    %80 = vector.extract_strided_slice %68 {offsets = [0, 96], sizes = [8, 32], strides = [1, 1]} : vector<8x128xf32> to vector<8x32xf32>
    %81 = math.tanh %80 : vector<8x32xf32>
    %82 = arith.mulf %78, %39 : vector<8x32xf32>
    %83 = arith.mulf %77, %81 : vector<8x32xf32>
    %84 = arith.addf %82, %83 : vector<8x32xf32>
    %85 = math.tanh %84 : vector<8x32xf32>
    %86 = arith.mulf %79, %85 : vector<8x32xf32>
    %87 = tpu.concatenate %86, %64 in 1 : vector<8x32xf32>, vector<8x32xf32> -> vector<8x64xf32>
    %c0_40 = arith.constant 0 : index
    %c0_41 = arith.constant 0 : index
    %88 = vector.load %arg5[%c0_40, %c0_41] : memref<64x256xf32, #tpu.memory_space<vmem>>, vector<64x256xf32>
    %cst_42 = arith.constant dense<0.000000e+00> : vector<8x256xf32>
    %89 = tpu.matmul %87, %88, %cst_42 {dimension_numbers = #tpu.dot_dimension_numbers<[1], [0], [0], [1], [0, 0, 1, 1], [], []>} : vector<8x64xf32>, vector<64x256xf32>, vector<8x256xf32> -> vector<8x256xf32>
    %90 = vector.extract_strided_slice %89 {offsets = [0, 128], sizes = [8, 128], strides = [1, 1]} : vector<8x256xf32> to vector<8x128xf32>
    %91 = arith.addf %90, %9 : vector<8x128xf32>
    %92 = vector.extract_strided_slice %91 {offsets = [0, 0], sizes = [8, 96], strides = [1, 1]} : vector<8x128xf32> to vector<8x96xf32>
    %cst_43 = arith.constant 5.000000e-01 : f32
    %93 = vector.broadcast %cst_43 : f32 to vector<8x96xf32>
    %94 = arith.mulf %93, %92 : vector<8x96xf32>
    %95 = math.tanh %94 : vector<8x96xf32>
    %cst_44 = arith.constant 5.000000e-01 : f32
    %96 = vector.broadcast %cst_44 : f32 to vector<8x96xf32>
    %97 = arith.mulf %96, %95 : vector<8x96xf32>
    %cst_45 = arith.constant 5.000000e-01 : f32
    %98 = vector.broadcast %cst_45 : f32 to vector<8x96xf32>
    %99 = arith.addf %97, %98 : vector<8x96xf32>
    %100 = vector.extract_strided_slice %99 {offsets = [0, 0], sizes = [8, 32], strides = [1, 1]} : vector<8x96xf32> to vector<8x32xf32>
    %101 = vector.extract_strided_slice %99 {offsets = [0, 32], sizes = [8, 32], strides = [1, 1]} : vector<8x96xf32> to vector<8x32xf32>
    %102 = vector.extract_strided_slice %99 {offsets = [0, 64], sizes = [8, 32], strides = [1, 1]} : vector<8x96xf32> to vector<8x32xf32>
    %103 = vector.extract_strided_slice %91 {offsets = [0, 96], sizes = [8, 32], strides = [1, 1]} : vector<8x128xf32> to vector<8x32xf32>
    %104 = math.tanh %103 : vector<8x32xf32>
    %105 = arith.mulf %101, %62 : vector<8x32xf32>
    %106 = arith.mulf %100, %104 : vector<8x32xf32>
    %107 = arith.addf %105, %106 : vector<8x32xf32>
    %108 = math.tanh %107 : vector<8x32xf32>
    %109 = arith.mulf %102, %108 : vector<8x32xf32>
    %c8_46 = arith.constant 8 : index
    %c0_47 = arith.constant 0 : index
    %110 = vector.load %arg13[%c8_46, %c0_47] : memref<64x32xf32, #tpu.memory_space<vmem>>, vector<8x32xf32>
    tpu.vector_store %arg13[%c8_46, %c0_47], %109 {strides = array<i32>} : memref<64x32xf32, #tpu.memory_space<vmem>>, vector<8x32xf32>,
    %c16 = arith.constant 16 : index
    %c0_48 = arith.constant 0 : index
    %111 = vector.load %arg12[%c16, %c0_48] : memref<64x128xf32, #tpu.memory_space<vmem>>, vector<8x128xf32>
    %112 = vector.extract_strided_slice %89 {offsets = [0, 0], sizes = [8, 128], strides = [1, 1]} : vector<8x256xf32> to vector<8x128xf32>
    %113 = arith.addf %111, %112 : vector<8x128xf32>
    %114 = vector.extract_strided_slice %113 {offsets = [0, 0], sizes = [8, 96], strides = [1, 1]} : vector<8x128xf32> to vector<8x96xf32>
    %cst_49 = arith.constant 5.000000e-01 : f32
    %115 = vector.broadcast %cst_49 : f32 to vector<8x96xf32>
    %116 = arith.mulf %115, %114 : vector<8x96xf32>
    %117 = math.tanh %116 : vector<8x96xf32>
    %cst_50 = arith.constant 5.000000e-01 : f32
    %118 = vector.broadcast %cst_50 : f32 to vector<8x96xf32>
    %119 = arith.mulf %118, %117 : vector<8x96xf32>
    %cst_51 = arith.constant 5.000000e-01 : f32
    %120 = vector.broadcast %cst_51 : f32 to vector<8x96xf32>
    %121 = arith.addf %119, %120 : vector<8x96xf32>
    %122 = vector.extract_strided_slice %121 {offsets = [0, 0], sizes = [8, 32], strides = [1, 1]} : vector<8x96xf32> to vector<8x32xf32>
    %123 = vector.extract_strided_slice %121 {offsets = [0, 32], sizes = [8, 32], strides = [1, 1]} : vector<8x96xf32> to vector<8x32xf32>
    %124 = vector.extract_strided_slice %121 {offsets = [0, 64], sizes = [8, 32], strides = [1, 1]} : vector<8x96xf32> to vector<8x32xf32>
    %125 = vector.extract_strided_slice %113 {offsets = [0, 96], sizes = [8, 32], strides = [1, 1]} : vector<8x128xf32> to vector<8x32xf32>
    %126 = math.tanh %125 : vector<8x32xf32>
    %127 = arith.mulf %123, %84 : vector<8x32xf32>
    %128 = arith.mulf %122, %126 : vector<8x32xf32>
    %129 = arith.addf %127, %128 : vector<8x32xf32>
    %130 = math.tanh %129 : vector<8x32xf32>
    %131 = arith.mulf %124, %130 : vector<8x32xf32>
    %132 = tpu.concatenate %131, %109 in 1 : vector<8x32xf32>, vector<8x32xf32> -> vector<8x64xf32>
    %c0_52 = arith.constant 0 : index
    %c0_53 = arith.constant 0 : index
    %133 = vector.load %arg5[%c0_52, %c0_53] : memref<64x256xf32, #tpu.memory_space<vmem>>, vector<64x256xf32>
    %cst_54 = arith.constant dense<0.000000e+00> : vector<8x256xf32>
    %134 = tpu.matmul %132, %133, %cst_54 {dimension_numbers = #tpu.dot_dimension_numbers<[1], [0], [0], [1], [0, 0, 1, 1], [], []>} : vector<8x64xf32>, vector<64x256xf32>, vector<8x256xf32> -> vector<8x256xf32>
    %135 = vector.extract_strided_slice %134 {offsets = [0, 128], sizes = [8, 128], strides = [1, 1]} : vector<8x256xf32> to vector<8x128xf32>
    %136 = arith.addf %135, %9 : vector<8x128xf32>
    %137 = vector.extract_strided_slice %136 {offsets = [0, 0], sizes = [8, 96], strides = [1, 1]} : vector<8x128xf32> to vector<8x96xf32>
    %cst_55 = arith.constant 5.000000e-01 : f32
    %138 = vector.broadcast %cst_55 : f32 to vector<8x96xf32>
    %139 = arith.mulf %138, %137 : vector<8x96xf32>
    %140 = math.tanh %139 : vector<8x96xf32>
    %cst_56 = arith.constant 5.000000e-01 : f32
    %141 = vector.broadcast %cst_56 : f32 to vector<8x96xf32>
    %142 = arith.mulf %141, %140 : vector<8x96xf32>
    %cst_57 = arith.constant 5.000000e-01 : f32
    %143 = vector.broadcast %cst_57 : f32 to vector<8x96xf32>
    %144 = arith.addf %142, %143 : vector<8x96xf32>
    %145 = vector.extract_strided_slice %144 {offsets = [0, 0], sizes = [8, 32], strides = [1, 1]} : vector<8x96xf32> to vector<8x32xf32>
    %146 = vector.extract_strided_slice %144 {offsets = [0, 32], sizes = [8, 32], strides = [1, 1]} : vector<8x96xf32> to vector<8x32xf32>
    %147 = vector.extract_strided_slice %144 {offsets = [0, 64], sizes = [8, 32], strides = [1, 1]} : vector<8x96xf32> to vector<8x32xf32>
    %148 = vector.extract_strided_slice %136 {offsets = [0, 96], sizes = [8, 32], strides = [1, 1]} : vector<8x128xf32> to vector<8x32xf32>
    %149 = math.tanh %148 : vector<8x32xf32>
    %150 = arith.mulf %146, %107 : vector<8x32xf32>
    %151 = arith.mulf %145, %149 : vector<8x32xf32>
    %152 = arith.addf %150, %151 : vector<8x32xf32>
    %153 = math.tanh %152 : vector<8x32xf32>
    %154 = arith.mulf %147, %153 : vector<8x32xf32>
    %c16_58 = arith.constant 16 : index
    %c0_59 = arith.constant 0 : index
    %155 = vector.load %arg13[%c16_58, %c0_59] : memref<64x32xf32, #tpu.memory_space<vmem>>, vector<8x32xf32>
    tpu.vector_store %arg13[%c16_58, %c0_59], %154 {strides = array<i32>} : memref<64x32xf32, #tpu.memory_space<vmem>>, vector<8x32xf32>,
    %c24 = arith.constant 24 : index
    %c0_60 = arith.constant 0 : index
    %156 = vector.load %arg12[%c24, %c0_60] : memref<64x128xf32, #tpu.memory_space<vmem>>, vector<8x128xf32>
    %157 = vector.extract_strided_slice %134 {offsets = [0, 0], sizes = [8, 128], strides = [1, 1]} : vector<8x256xf32> to vector<8x128xf32>
    %158 = arith.addf %156, %157 : vector<8x128xf32>
    %159 = vector.extract_strided_slice %158 {offsets = [0, 0], sizes = [8, 96], strides = [1, 1]} : vector<8x128xf32> to vector<8x96xf32>
    %cst_61 = arith.constant 5.000000e-01 : f32
    %160 = vector.broadcast %cst_61 : f32 to vector<8x96xf32>
    %161 = arith.mulf %160, %159 : vector<8x96xf32>
    %162 = math.tanh %161 : vector<8x96xf32>
    %cst_62 = arith.constant 5.000000e-01 : f32
    %163 = vector.broadcast %cst_62 : f32 to vector<8x96xf32>
    %164 = arith.mulf %163, %162 : vector<8x96xf32>
    %cst_63 = arith.constant 5.000000e-01 : f32
    %165 = vector.broadcast %cst_63 : f32 to vector<8x96xf32>
    %166 = arith.addf %164, %165 : vector<8x96xf32>
    %167 = vector.extract_strided_slice %166 {offsets = [0, 0], sizes = [8, 32], strides = [1, 1]} : vector<8x96xf32> to vector<8x32xf32>
    %168 = vector.extract_strided_slice %166 {offsets = [0, 32], sizes = [8, 32], strides = [1, 1]} : vector<8x96xf32> to vector<8x32xf32>
    %169 = vector.extract_strided_slice %166 {offsets = [0, 64], sizes = [8, 32], strides = [1, 1]} : vector<8x96xf32> to vector<8x32xf32>
    %170 = vector.extract_strided_slice %158 {offsets = [0, 96], sizes = [8, 32], strides = [1, 1]} : vector<8x128xf32> to vector<8x32xf32>
    %171 = math.tanh %170 : vector<8x32xf32>
    %172 = arith.mulf %168, %129 : vector<8x32xf32>
    %173 = arith.mulf %167, %171 : vector<8x32xf32>
    %174 = arith.addf %172, %173 : vector<8x32xf32>
    %175 = math.tanh %174 : vector<8x32xf32>
    %176 = arith.mulf %169, %175 : vector<8x32xf32>
    %177 = tpu.concatenate %176, %154 in 1 : vector<8x32xf32>, vector<8x32xf32> -> vector<8x64xf32>
    %c0_64 = arith.constant 0 : index
    %c0_65 = arith.constant 0 : index
    %178 = vector.load %arg5[%c0_64, %c0_65] : memref<64x256xf32, #tpu.memory_space<vmem>>, vector<64x256xf32>
    %cst_66 = arith.constant dense<0.000000e+00> : vector<8x256xf32>
    %179 = tpu.matmul %177, %178, %cst_66 {dimension_numbers = #tpu.dot_dimension_numbers<[1], [0], [0], [1], [0, 0, 1, 1], [], []>} : vector<8x64xf32>, vector<64x256xf32>, vector<8x256xf32> -> vector<8x256xf32>
    %180 = vector.extract_strided_slice %179 {offsets = [0, 128], sizes = [8, 128], strides = [1, 1]} : vector<8x256xf32> to vector<8x128xf32>
    %181 = arith.addf %180, %9 : vector<8x128xf32>
    %182 = vector.extract_strided_slice %181 {offsets = [0, 0], sizes = [8, 96], strides = [1, 1]} : vector<8x128xf32> to vector<8x96xf32>
    %cst_67 = arith.constant 5.000000e-01 : f32
    %183 = vector.broadcast %cst_67 : f32 to vector<8x96xf32>
    %184 = arith.mulf %183, %182 : vector<8x96xf32>
    %185 = math.tanh %184 : vector<8x96xf32>
    %cst_68 = arith.constant 5.000000e-01 : f32
    %186 = vector.broadcast %cst_68 : f32 to vector<8x96xf32>
    %187 = arith.mulf %186, %185 : vector<8x96xf32>
    %cst_69 = arith.constant 5.000000e-01 : f32
    %188 = vector.broadcast %cst_69 : f32 to vector<8x96xf32>
    %189 = arith.addf %187, %188 : vector<8x96xf32>
    %190 = vector.extract_strided_slice %189 {offsets = [0, 0], sizes = [8, 32], strides = [1, 1]} : vector<8x96xf32> to vector<8x32xf32>
    %191 = vector.extract_strided_slice %189 {offsets = [0, 32], sizes = [8, 32], strides = [1, 1]} : vector<8x96xf32> to vector<8x32xf32>
    %192 = vector.extract_strided_slice %189 {offsets = [0, 64], sizes = [8, 32], strides = [1, 1]} : vector<8x96xf32> to vector<8x32xf32>
    %193 = vector.extract_strided_slice %181 {offsets = [0, 96], sizes = [8, 32], strides = [1, 1]} : vector<8x128xf32> to vector<8x32xf32>
    %194 = math.tanh %193 : vector<8x32xf32>
    %195 = arith.mulf %191, %152 : vector<8x32xf32>
    %196 = arith.mulf %190, %194 : vector<8x32xf32>
    %197 = arith.addf %195, %196 : vector<8x32xf32>
    %198 = math.tanh %197 : vector<8x32xf32>
    %199 = arith.mulf %192, %198 : vector<8x32xf32>
    %c24_70 = arith.constant 24 : index
    %c0_71 = arith.constant 0 : index
    %200 = vector.load %arg13[%c24_70, %c0_71] : memref<64x32xf32, #tpu.memory_space<vmem>>, vector<8x32xf32>
    tpu.vector_store %arg13[%c24_70, %c0_71], %199 {strides = array<i32>} : memref<64x32xf32, #tpu.memory_space<vmem>>, vector<8x32xf32>,
    %c32 = arith.constant 32 : index
    %c0_72 = arith.constant 0 : index
    %201 = vector.load %arg12[%c32, %c0_72] : memref<64x128xf32, #tpu.memory_space<vmem>>, vector<8x128xf32>
    %202 = vector.extract_strided_slice %179 {offsets = [0, 0], sizes = [8, 128], strides = [1, 1]} : vector<8x256xf32> to vector<8x128xf32>
    %203 = arith.addf %201, %202 : vector<8x128xf32>
    %204 = vector.extract_strided_slice %203 {offsets = [0, 0], sizes = [8, 96], strides = [1, 1]} : vector<8x128xf32> to vector<8x96xf32>
    %cst_73 = arith.constant 5.000000e-01 : f32
    %205 = vector.broadcast %cst_73 : f32 to vector<8x96xf32>
    %206 = arith.mulf %205, %204 : vector<8x96xf32>
    %207 = math.tanh %206 : vector<8x96xf32>
    %cst_74 = arith.constant 5.000000e-01 : f32
    %208 = vector.broadcast %cst_74 : f32 to vector<8x96xf32>
    %209 = arith.mulf %208, %207 : vector<8x96xf32>
    %cst_75 = arith.constant 5.000000e-01 : f32
    %210 = vector.broadcast %cst_75 : f32 to vector<8x96xf32>
    %211 = arith.addf %209, %210 : vector<8x96xf32>
    %212 = vector.extract_strided_slice %211 {offsets = [0, 0], sizes = [8, 32], strides = [1, 1]} : vector<8x96xf32> to vector<8x32xf32>
    %213 = vector.extract_strided_slice %211 {offsets = [0, 32], sizes = [8, 32], strides = [1, 1]} : vector<8x96xf32> to vector<8x32xf32>
    %214 = vector.extract_strided_slice %211 {offsets = [0, 64], sizes = [8, 32], strides = [1, 1]} : vector<8x96xf32> to vector<8x32xf32>
    %215 = vector.extract_strided_slice %203 {offsets = [0, 96], sizes = [8, 32], strides = [1, 1]} : vector<8x128xf32> to vector<8x32xf32>
    %216 = math.tanh %215 : vector<8x32xf32>
    %217 = arith.mulf %213, %174 : vector<8x32xf32>
    %218 = arith.mulf %212, %216 : vector<8x32xf32>
    %219 = arith.addf %217, %218 : vector<8x32xf32>
    %220 = math.tanh %219 : vector<8x32xf32>
    %221 = arith.mulf %214, %220 : vector<8x32xf32>
    %222 = tpu.concatenate %221, %199 in 1 : vector<8x32xf32>, vector<8x32xf32> -> vector<8x64xf32>
    %c0_76 = arith.constant 0 : index
    %c0_77 = arith.constant 0 : index
    %223 = vector.load %arg5[%c0_76, %c0_77] : memref<64x256xf32, #tpu.memory_space<vmem>>, vector<64x256xf32>
    %cst_78 = arith.constant dense<0.000000e+00> : vector<8x256xf32>
    %224 = tpu.matmul %222, %223, %cst_78 {dimension_numbers = #tpu.dot_dimension_numbers<[1], [0], [0], [1], [0, 0, 1, 1], [], []>} : vector<8x64xf32>, vector<64x256xf32>, vector<8x256xf32> -> vector<8x256xf32>
    %225 = vector.extract_strided_slice %224 {offsets = [0, 128], sizes = [8, 128], strides = [1, 1]} : vector<8x256xf32> to vector<8x128xf32>
    %226 = arith.addf %225, %9 : vector<8x128xf32>
    %227 = vector.extract_strided_slice %226 {offsets = [0, 0], sizes = [8, 96], strides = [1, 1]} : vector<8x128xf32> to vector<8x96xf32>
    %cst_79 = arith.constant 5.000000e-01 : f32
    %228 = vector.broadcast %cst_79 : f32 to vector<8x96xf32>
    %229 = arith.mulf %228, %227 : vector<8x96xf32>
    %230 = math.tanh %229 : vector<8x96xf32>
    %cst_80 = arith.constant 5.000000e-01 : f32
    %231 = vector.broadcast %cst_80 : f32 to vector<8x96xf32>
    %232 = arith.mulf %231, %230 : vector<8x96xf32>
    %cst_81 = arith.constant 5.000000e-01 : f32
    %233 = vector.broadcast %cst_81 : f32 to vector<8x96xf32>
    %234 = arith.addf %232, %233 : vector<8x96xf32>
    %235 = vector.extract_strided_slice %234 {offsets = [0, 0], sizes = [8, 32], strides = [1, 1]} : vector<8x96xf32> to vector<8x32xf32>
    %236 = vector.extract_strided_slice %234 {offsets = [0, 32], sizes = [8, 32], strides = [1, 1]} : vector<8x96xf32> to vector<8x32xf32>
    %237 = vector.extract_strided_slice %234 {offsets = [0, 64], sizes = [8, 32], strides = [1, 1]} : vector<8x96xf32> to vector<8x32xf32>
    %238 = vector.extract_strided_slice %226 {offsets = [0, 96], sizes = [8, 32], strides = [1, 1]} : vector<8x128xf32> to vector<8x32xf32>
    %239 = math.tanh %238 : vector<8x32xf32>
    %240 = arith.mulf %236, %197 : vector<8x32xf32>
    %241 = arith.mulf %235, %239 : vector<8x32xf32>
    %242 = arith.addf %240, %241 : vector<8x32xf32>
    %243 = math.tanh %242 : vector<8x32xf32>
    %244 = arith.mulf %237, %243 : vector<8x32xf32>
    %c32_82 = arith.constant 32 : index
    %c0_83 = arith.constant 0 : index
    %245 = vector.load %arg13[%c32_82, %c0_83] : memref<64x32xf32, #tpu.memory_space<vmem>>, vector<8x32xf32>
    tpu.vector_store %arg13[%c32_82, %c0_83], %244 {strides = array<i32>} : memref<64x32xf32, #tpu.memory_space<vmem>>, vector<8x32xf32>,
    %c40 = arith.constant 40 : index
    %c0_84 = arith.constant 0 : index
    %246 = vector.load %arg12[%c40, %c0_84] : memref<64x128xf32, #tpu.memory_space<vmem>>, vector<8x128xf32>
    %247 = vector.extract_strided_slice %224 {offsets = [0, 0], sizes = [8, 128], strides = [1, 1]} : vector<8x256xf32> to vector<8x128xf32>
    %248 = arith.addf %246, %247 : vector<8x128xf32>
    %249 = vector.extract_strided_slice %248 {offsets = [0, 0], sizes = [8, 96], strides = [1, 1]} : vector<8x128xf32> to vector<8x96xf32>
    %cst_85 = arith.constant 5.000000e-01 : f32
    %250 = vector.broadcast %cst_85 : f32 to vector<8x96xf32>
    %251 = arith.mulf %250, %249 : vector<8x96xf32>
    %252 = math.tanh %251 : vector<8x96xf32>
    %cst_86 = arith.constant 5.000000e-01 : f32
    %253 = vector.broadcast %cst_86 : f32 to vector<8x96xf32>
    %254 = arith.mulf %253, %252 : vector<8x96xf32>
    %cst_87 = arith.constant 5.000000e-01 : f32
    %255 = vector.broadcast %cst_87 : f32 to vector<8x96xf32>
    %256 = arith.addf %254, %255 : vector<8x96xf32>
    %257 = vector.extract_strided_slice %256 {offsets = [0, 0], sizes = [8, 32], strides = [1, 1]} : vector<8x96xf32> to vector<8x32xf32>
    %258 = vector.extract_strided_slice %256 {offsets = [0, 32], sizes = [8, 32], strides = [1, 1]} : vector<8x96xf32> to vector<8x32xf32>
    %259 = vector.extract_strided_slice %256 {offsets = [0, 64], sizes = [8, 32], strides = [1, 1]} : vector<8x96xf32> to vector<8x32xf32>
    %260 = vector.extract_strided_slice %248 {offsets = [0, 96], sizes = [8, 32], strides = [1, 1]} : vector<8x128xf32> to vector<8x32xf32>
    %261 = math.tanh %260 : vector<8x32xf32>
    %262 = arith.mulf %258, %219 : vector<8x32xf32>
    %263 = arith.mulf %257, %261 : vector<8x32xf32>
    %264 = arith.addf %262, %263 : vector<8x32xf32>
    %265 = math.tanh %264 : vector<8x32xf32>
    %266 = arith.mulf %259, %265 : vector<8x32xf32>
    %267 = tpu.concatenate %266, %244 in 1 : vector<8x32xf32>, vector<8x32xf32> -> vector<8x64xf32>
    %c0_88 = arith.constant 0 : index
    %c0_89 = arith.constant 0 : index
    %268 = vector.load %arg5[%c0_88, %c0_89] : memref<64x256xf32, #tpu.memory_space<vmem>>, vector<64x256xf32>
    %cst_90 = arith.constant dense<0.000000e+00> : vector<8x256xf32>
    %269 = tpu.matmul %267, %268, %cst_90 {dimension_numbers = #tpu.dot_dimension_numbers<[1], [0], [0], [1], [0, 0, 1, 1], [], []>} : vector<8x64xf32>, vector<64x256xf32>, vector<8x256xf32> -> vector<8x256xf32>
    %270 = vector.extract_strided_slice %269 {offsets = [0, 128], sizes = [8, 128], strides = [1, 1]} : vector<8x256xf32> to vector<8x128xf32>
    %271 = arith.addf %270, %9 : vector<8x128xf32>
    %272 = vector.extract_strided_slice %271 {offsets = [0, 0], sizes = [8, 96], strides = [1, 1]} : vector<8x128xf32> to vector<8x96xf32>
    %cst_91 = arith.constant 5.000000e-01 : f32
    %273 = vector.broadcast %cst_91 : f32 to vector<8x96xf32>
    %274 = arith.mulf %273, %272 : vector<8x96xf32>
    %275 = math.tanh %274 : vector<8x96xf32>
    %cst_92 = arith.constant 5.000000e-01 : f32
    %276 = vector.broadcast %cst_92 : f32 to vector<8x96xf32>
    %277 = arith.mulf %276, %275 : vector<8x96xf32>
    %cst_93 = arith.constant 5.000000e-01 : f32
    %278 = vector.broadcast %cst_93 : f32 to vector<8x96xf32>
    %279 = arith.addf %277, %278 : vector<8x96xf32>
    %280 = vector.extract_strided_slice %279 {offsets = [0, 0], sizes = [8, 32], strides = [1, 1]} : vector<8x96xf32> to vector<8x32xf32>
    %281 = vector.extract_strided_slice %279 {offsets = [0, 32], sizes = [8, 32], strides = [1, 1]} : vector<8x96xf32> to vector<8x32xf32>
    %282 = vector.extract_strided_slice %279 {offsets = [0, 64], sizes = [8, 32], strides = [1, 1]} : vector<8x96xf32> to vector<8x32xf32>
    %283 = vector.extract_strided_slice %271 {offsets = [0, 96], sizes = [8, 32], strides = [1, 1]} : vector<8x128xf32> to vector<8x32xf32>
    %284 = math.tanh %283 : vector<8x32xf32>
    %285 = arith.mulf %281, %242 : vector<8x32xf32>
    %286 = arith.mulf %280, %284 : vector<8x32xf32>
    %287 = arith.addf %285, %286 : vector<8x32xf32>
    %288 = math.tanh %287 : vector<8x32xf32>
    %289 = arith.mulf %282, %288 : vector<8x32xf32>
    %c40_94 = arith.constant 40 : index
    %c0_95 = arith.constant 0 : index
    %290 = vector.load %arg13[%c40_94, %c0_95] : memref<64x32xf32, #tpu.memory_space<vmem>>, vector<8x32xf32>
    tpu.vector_store %arg13[%c40_94, %c0_95], %289 {strides = array<i32>} : memref<64x32xf32, #tpu.memory_space<vmem>>, vector<8x32xf32>,
    %c48 = arith.constant 48 : index
    %c0_96 = arith.constant 0 : index
    %291 = vector.load %arg12[%c48, %c0_96] : memref<64x128xf32, #tpu.memory_space<vmem>>, vector<8x128xf32>
    %292 = vector.extract_strided_slice %269 {offsets = [0, 0], sizes = [8, 128], strides = [1, 1]} : vector<8x256xf32> to vector<8x128xf32>
    %293 = arith.addf %291, %292 : vector<8x128xf32>
    %294 = vector.extract_strided_slice %293 {offsets = [0, 0], sizes = [8, 96], strides = [1, 1]} : vector<8x128xf32> to vector<8x96xf32>
    %cst_97 = arith.constant 5.000000e-01 : f32
    %295 = vector.broadcast %cst_97 : f32 to vector<8x96xf32>
    %296 = arith.mulf %295, %294 : vector<8x96xf32>
    %297 = math.tanh %296 : vector<8x96xf32>
    %cst_98 = arith.constant 5.000000e-01 : f32
    %298 = vector.broadcast %cst_98 : f32 to vector<8x96xf32>
    %299 = arith.mulf %298, %297 : vector<8x96xf32>
    %cst_99 = arith.constant 5.000000e-01 : f32
    %300 = vector.broadcast %cst_99 : f32 to vector<8x96xf32>
    %301 = arith.addf %299, %300 : vector<8x96xf32>
    %302 = vector.extract_strided_slice %301 {offsets = [0, 0], sizes = [8, 32], strides = [1, 1]} : vector<8x96xf32> to vector<8x32xf32>
    %303 = vector.extract_strided_slice %301 {offsets = [0, 32], sizes = [8, 32], strides = [1, 1]} : vector<8x96xf32> to vector<8x32xf32>
    %304 = vector.extract_strided_slice %301 {offsets = [0, 64], sizes = [8, 32], strides = [1, 1]} : vector<8x96xf32> to vector<8x32xf32>
    %305 = vector.extract_strided_slice %293 {offsets = [0, 96], sizes = [8, 32], strides = [1, 1]} : vector<8x128xf32> to vector<8x32xf32>
    %306 = math.tanh %305 : vector<8x32xf32>
    %307 = arith.mulf %303, %264 : vector<8x32xf32>
    %308 = arith.mulf %302, %306 : vector<8x32xf32>
    %309 = arith.addf %307, %308 : vector<8x32xf32>
    %310 = math.tanh %309 : vector<8x32xf32>
    %311 = arith.mulf %304, %310 : vector<8x32xf32>
    %312 = tpu.concatenate %311, %289 in 1 : vector<8x32xf32>, vector<8x32xf32> -> vector<8x64xf32>
    %c0_100 = arith.constant 0 : index
    %c0_101 = arith.constant 0 : index
    %313 = vector.load %arg5[%c0_100, %c0_101] : memref<64x256xf32, #tpu.memory_space<vmem>>, vector<64x256xf32>
    %cst_102 = arith.constant dense<0.000000e+00> : vector<8x256xf32>
    %314 = tpu.matmul %312, %313, %cst_102 {dimension_numbers = #tpu.dot_dimension_numbers<[1], [0], [0], [1], [0, 0, 1, 1], [], []>} : vector<8x64xf32>, vector<64x256xf32>, vector<8x256xf32> -> vector<8x256xf32>
    %315 = vector.extract_strided_slice %314 {offsets = [0, 128], sizes = [8, 128], strides = [1, 1]} : vector<8x256xf32> to vector<8x128xf32>
    %316 = arith.addf %315, %9 : vector<8x128xf32>
    %317 = vector.extract_strided_slice %316 {offsets = [0, 0], sizes = [8, 96], strides = [1, 1]} : vector<8x128xf32> to vector<8x96xf32>
    %cst_103 = arith.constant 5.000000e-01 : f32
    %318 = vector.broadcast %cst_103 : f32 to vector<8x96xf32>
    %319 = arith.mulf %318, %317 : vector<8x96xf32>
    %320 = math.tanh %319 : vector<8x96xf32>
    %cst_104 = arith.constant 5.000000e-01 : f32
    %321 = vector.broadcast %cst_104 : f32 to vector<8x96xf32>
    %322 = arith.mulf %321, %320 : vector<8x96xf32>
    %cst_105 = arith.constant 5.000000e-01 : f32
    %323 = vector.broadcast %cst_105 : f32 to vector<8x96xf32>
    %324 = arith.addf %322, %323 : vector<8x96xf32>
    %325 = vector.extract_strided_slice %324 {offsets = [0, 0], sizes = [8, 32], strides = [1, 1]} : vector<8x96xf32> to vector<8x32xf32>
    %326 = vector.extract_strided_slice %324 {offsets = [0, 32], sizes = [8, 32], strides = [1, 1]} : vector<8x96xf32> to vector<8x32xf32>
    %327 = vector.extract_strided_slice %324 {offsets = [0, 64], sizes = [8, 32], strides = [1, 1]} : vector<8x96xf32> to vector<8x32xf32>
    %328 = vector.extract_strided_slice %316 {offsets = [0, 96], sizes = [8, 32], strides = [1, 1]} : vector<8x128xf32> to vector<8x32xf32>
    %329 = math.tanh %328 : vector<8x32xf32>
    %330 = arith.mulf %326, %287 : vector<8x32xf32>
    %331 = arith.mulf %325, %329 : vector<8x32xf32>
    %332 = arith.addf %330, %331 : vector<8x32xf32>
    %333 = math.tanh %332 : vector<8x32xf32>
    %334 = arith.mulf %327, %333 : vector<8x32xf32>
    %c48_106 = arith.constant 48 : index
    %c0_107 = arith.constant 0 : index
    %335 = vector.load %arg13[%c48_106, %c0_107] : memref<64x32xf32, #tpu.memory_space<vmem>>, vector<8x32xf32>
    tpu.vector_store %arg13[%c48_106, %c0_107], %334 {strides = array<i32>} : memref<64x32xf32, #tpu.memory_space<vmem>>, vector<8x32xf32>,
    %c56 = arith.constant 56 : index
    %c0_108 = arith.constant 0 : index
    %336 = vector.load %arg12[%c56, %c0_108] : memref<64x128xf32, #tpu.memory_space<vmem>>, vector<8x128xf32>
    %337 = vector.extract_strided_slice %314 {offsets = [0, 0], sizes = [8, 128], strides = [1, 1]} : vector<8x256xf32> to vector<8x128xf32>
    %338 = arith.addf %336, %337 : vector<8x128xf32>
    %339 = vector.extract_strided_slice %338 {offsets = [0, 0], sizes = [8, 96], strides = [1, 1]} : vector<8x128xf32> to vector<8x96xf32>
    %cst_109 = arith.constant 5.000000e-01 : f32
    %340 = vector.broadcast %cst_109 : f32 to vector<8x96xf32>
    %341 = arith.mulf %340, %339 : vector<8x96xf32>
    %342 = math.tanh %341 : vector<8x96xf32>
    %cst_110 = arith.constant 5.000000e-01 : f32
    %343 = vector.broadcast %cst_110 : f32 to vector<8x96xf32>
    %344 = arith.mulf %343, %342 : vector<8x96xf32>
    %cst_111 = arith.constant 5.000000e-01 : f32
    %345 = vector.broadcast %cst_111 : f32 to vector<8x96xf32>
    %346 = arith.addf %344, %345 : vector<8x96xf32>
    %347 = vector.extract_strided_slice %346 {offsets = [0, 0], sizes = [8, 32], strides = [1, 1]} : vector<8x96xf32> to vector<8x32xf32>
    %348 = vector.extract_strided_slice %346 {offsets = [0, 32], sizes = [8, 32], strides = [1, 1]} : vector<8x96xf32> to vector<8x32xf32>
    %349 = vector.extract_strided_slice %346 {offsets = [0, 64], sizes = [8, 32], strides = [1, 1]} : vector<8x96xf32> to vector<8x32xf32>
    %350 = vector.extract_strided_slice %338 {offsets = [0, 96], sizes = [8, 32], strides = [1, 1]} : vector<8x128xf32> to vector<8x32xf32>
    %351 = math.tanh %350 : vector<8x32xf32>
    %352 = arith.mulf %348, %309 : vector<8x32xf32>
    %353 = arith.mulf %347, %351 : vector<8x32xf32>
    %354 = arith.addf %352, %353 : vector<8x32xf32>
    %355 = math.tanh %354 : vector<8x32xf32>
    %356 = arith.mulf %349, %355 : vector<8x32xf32>
    %357 = tpu.concatenate %356, %334 in 1 : vector<8x32xf32>, vector<8x32xf32> -> vector<8x64xf32>
    %c0_112 = arith.constant 0 : index
    %c0_113 = arith.constant 0 : index
    %358 = vector.load %arg5[%c0_112, %c0_113] : memref<64x256xf32, #tpu.memory_space<vmem>>, vector<64x256xf32>
    %cst_114 = arith.constant dense<0.000000e+00> : vector<8x256xf32>
    %359 = tpu.matmul %357, %358, %cst_114 {dimension_numbers = #tpu.dot_dimension_numbers<[1], [0], [0], [1], [0, 0, 1, 1], [], []>} : vector<8x64xf32>, vector<64x256xf32>, vector<8x256xf32> -> vector<8x256xf32>
    %360 = vector.extract_strided_slice %359 {offsets = [0, 128], sizes = [8, 128], strides = [1, 1]} : vector<8x256xf32> to vector<8x128xf32>
    %361 = arith.addf %360, %9 : vector<8x128xf32>
    %362 = vector.extract_strided_slice %361 {offsets = [0, 0], sizes = [8, 96], strides = [1, 1]} : vector<8x128xf32> to vector<8x96xf32>
    %cst_115 = arith.constant 5.000000e-01 : f32
    %363 = vector.broadcast %cst_115 : f32 to vector<8x96xf32>
    %364 = arith.mulf %363, %362 : vector<8x96xf32>
    %365 = math.tanh %364 : vector<8x96xf32>
    %cst_116 = arith.constant 5.000000e-01 : f32
    %366 = vector.broadcast %cst_116 : f32 to vector<8x96xf32>
    %367 = arith.mulf %366, %365 : vector<8x96xf32>
    %cst_117 = arith.constant 5.000000e-01 : f32
    %368 = vector.broadcast %cst_117 : f32 to vector<8x96xf32>
    %369 = arith.addf %367, %368 : vector<8x96xf32>
    %370 = vector.extract_strided_slice %369 {offsets = [0, 0], sizes = [8, 32], strides = [1, 1]} : vector<8x96xf32> to vector<8x32xf32>
    %371 = vector.extract_strided_slice %369 {offsets = [0, 32], sizes = [8, 32], strides = [1, 1]} : vector<8x96xf32> to vector<8x32xf32>
    %372 = vector.extract_strided_slice %369 {offsets = [0, 64], sizes = [8, 32], strides = [1, 1]} : vector<8x96xf32> to vector<8x32xf32>
    %373 = vector.extract_strided_slice %361 {offsets = [0, 96], sizes = [8, 32], strides = [1, 1]} : vector<8x128xf32> to vector<8x32xf32>
    %374 = math.tanh %373 : vector<8x32xf32>
    %375 = arith.mulf %371, %332 : vector<8x32xf32>
    %376 = arith.mulf %370, %374 : vector<8x32xf32>
    %377 = arith.addf %375, %376 : vector<8x32xf32>
    %378 = math.tanh %377 : vector<8x32xf32>
    %379 = arith.mulf %372, %378 : vector<8x32xf32>
    %c56_118 = arith.constant 56 : index
    %c0_119 = arith.constant 0 : index
    %380 = vector.load %arg13[%c56_118, %c0_119] : memref<64x32xf32, #tpu.memory_space<vmem>>, vector<8x32xf32>
    tpu.vector_store %arg13[%c56_118, %c0_119], %379 {strides = array<i32>} : memref<64x32xf32, #tpu.memory_space<vmem>>, vector<8x32xf32>,
    %c0_120 = arith.constant 0 : index
    %c0_121 = arith.constant 0 : index
    %c0_122 = arith.constant 0 : index
    %381 = vector.load %arg10[%c0_120, %c0_121, %c0_122] : memref<2x8x32xf32, #tpu.memory_space<vmem>>, vector<1x8x32xf32>
    %382 = vector.shape_cast %381 : vector<1x8x32xf32> to vector<8x32xf32>
    %383 = vector.shape_cast %356 : vector<8x32xf32> to vector<1x8x32xf32>
    tpu.vector_store %arg10[%c0_120, %c0_121, %c0_122], %383 {strides = array<i32>} : memref<2x8x32xf32, #tpu.memory_space<vmem>>, vector<1x8x32xf32>,
    %c1_123 = arith.constant 1 : index
    %c0_124 = arith.constant 0 : index
    %c0_125 = arith.constant 0 : index
    %384 = vector.load %arg10[%c1_123, %c0_124, %c0_125] : memref<2x8x32xf32, #tpu.memory_space<vmem>>, vector<1x8x32xf32>
    %385 = vector.shape_cast %384 : vector<1x8x32xf32> to vector<8x32xf32>
    %386 = vector.shape_cast %379 : vector<8x32xf32> to vector<1x8x32xf32>
    tpu.vector_store %arg10[%c1_123, %c0_124, %c0_125], %386 {strides = array<i32>} : memref<2x8x32xf32, #tpu.memory_space<vmem>>, vector<1x8x32xf32>,
    %c0_126 = arith.constant 0 : index
    %c0_127 = arith.constant 0 : index
    %c0_128 = arith.constant 0 : index
    %387 = vector.load %arg11[%c0_126, %c0_127, %c0_128] : memref<2x8x32xf32, #tpu.memory_space<vmem>>, vector<1x8x32xf32>
    %388 = vector.shape_cast %387 : vector<1x8x32xf32> to vector<8x32xf32>
    %389 = vector.shape_cast %354 : vector<8x32xf32> to vector<1x8x32xf32>
    tpu.vector_store %arg11[%c0_126, %c0_127, %c0_128], %389 {strides = array<i32>} : memref<2x8x32xf32, #tpu.memory_space<vmem>>, vector<1x8x32xf32>,
    %c1_129 = arith.constant 1 : index
    %c0_130 = arith.constant 0 : index
    %c0_131 = arith.constant 0 : index
    %390 = vector.load %arg11[%c1_129, %c0_130, %c0_131] : memref<2x8x32xf32, #tpu.memory_space<vmem>>, vector<1x8x32xf32>
    %391 = vector.shape_cast %390 : vector<1x8x32xf32> to vector<8x32xf32>
    %392 = vector.shape_cast %377 : vector<8x32xf32> to vector<1x8x32xf32>
    tpu.vector_store %arg11[%c1_129, %c0_130, %c0_131], %392 {strides = array<i32>} : memref<2x8x32xf32, #tpu.memory_space<vmem>>, vector<1x8x32xf32>,
    %c0_132 = arith.constant 0 : index
    %c0_133 = arith.constant 0 : index
    %393 = vector.load %arg13[%c0_132, %c0_133] : memref<64x32xf32, #tpu.memory_space<vmem>>, vector<64x32xf32>
    %c0_134 = arith.constant 0 : index
    %c0_135 = arith.constant 0 : index
    %394 = vector.load %arg7[%c0_134, %c0_135] : memref<32x128xf32, #tpu.memory_space<vmem>>, vector<32x128xf32>
    %cst_136 = arith.constant dense<0.000000e+00> : vector<64x128xf32>
    %395 = tpu.matmul %393, %394, %cst_136 {dimension_numbers = #tpu.dot_dimension_numbers<[1], [0], [0], [1], [0, 0, 1, 1], [], []>} : vector<64x32xf32>, vector<32x128xf32>, vector<64x128xf32> -> vector<64x128xf32>
    %c0_137 = arith.constant 0 : index
    %c0_138 = arith.constant 0 : index
    %396 = vector.load %arg8[%c0_137, %c0_138] : memref<1x128xf32, #tpu.memory_space<vmem>>, vector<1x128xf32>
    %397 = vector.broadcast %396 : vector<1x128xf32> to vector<64x128xf32>
    %398 = arith.addf %395, %397 : vector<64x128xf32>
    %c0_139 = arith.constant 0 : index
    %c0_140 = arith.constant 0 : index
    %399 = vector.load %arg9[%c0_139, %c0_140] : memref<64x128xf32, #tpu.memory_space<vmem>>, vector<64x128xf32>
    tpu.vector_store %arg9[%c0_139, %c0_140], %398 {strides = array<i32>} : memref<64x128xf32, #tpu.memory_space<vmem>>, vector<64x128xf32>,
    return
  }
}

</mosaic_0001>

<bundles_post_ra>
// kernel: tpu_custom_call.1
= control target key start
LH: loop header
LB: loop body
LE: loop exit
PB: predicated region body
PF: predicated region fallthrough
CT: control target
= control target key end

     0   :  { %17 = vsyncpa [#allocation5], 0  ;;  %s2624_s0 = inlined_call_operand.vmem [shape: f32[64,16], index: 0, kind: input, shape index: {}]   ;;  %s2625_s1 = inlined_call_operand.vmem [shape: f32[2,8,32], index: 1, kind: input, shape index: {}]   ;;  %s2626_s2 = inlined_call_operand.vmem [shape: f32[2,8,32], index: 2, kind: input, shape index: {}]   ;;  %s2627_s3 = inlined_call_operand.vmem [shape: f32[16,128], index: 3, kind: input, shape index: {}]   ;;  %s2628_s4 = inlined_call_operand.vmem [shape: f32[1,128], index: 4, kind: input, shape index: {}]   ;;  %s2629_s5 = inlined_call_operand.hbm [shape: f32[64,256], index: 5, kind: input, shape index: {}]   ;;  %s2630_s6 = inlined_call_operand.vmem [shape: f32[1,128], index: 6, kind: input, shape index: {}]   ;;  %s2631_s7 = inlined_call_operand.vmem [shape: f32[32,128], index: 7, kind: input, shape index: {}]   ;;  %s2632_s8 = inlined_call_operand.vmem [shape: f32[1,128], index: 8, kind: input, shape index: {}]   ;;  %s2633_s9 = inlined_call_operand.hbm [shape: f32[64,128], index: 9, kind: output, shape index: {0}]   ;;  %s2634_s10 = inlined_call_operand.hbm [shape: f32[2,8,32], index: 10, kind: output, shape index: {1}]   ;;  %s2635_s11 = inlined_call_operand.hbm [shape: f32[2,8,32], index: 11, kind: output, shape index: {2}]  }
   0x1   :  { %18 = vsyncpa [#allocation6], 0 }
   0x2   :  { %19 = vsyncpa [#allocation9], 0  ;;  %s2167_s17 = smov [#allocation4]   ;;  %s2073_s21 = scalar_lea.hbm %s2629_s5, 2048 }
   0x3   :  { %s35_s18 = sshll.u32 %s2167_s17, 4  ;;  %p2074_p0 = scmp.ne.s32.totalorder %s2629_s5, %s2073_s21  ;;  %s36_s18 = int_to_ptr.vmem [resolvable:$true] %s35_s18 }
   0x4   :  { %p2077_p1 = scmp.lt.u32.totalorder %s2073_s21, %s2629_s5 }
   0x6   :  { %p2079_p2 = pnand %p2077_p1, %p2074_p0 }
   0x8   :  { %2082 = shalt.err (!%p2079_p2)
}
   0x9   :  { %s2083_s26 = scalar_lea.vmem %s36_s18, 2048  ;;  %p2088_p4 = scmp.lt.s32.totalorder %s36_s18, %s36_s18 }
   0xa   :  { %p2084_p3 = scmp.ne.s32.totalorder %s36_s18, %s2083_s26  ;;  %p2089_p5 = scmp.lt.s32.totalorder %s2083_s26, %s2083_s26 }
   0xc   :  { %p2090_p6 = por %p2089_p5, %p2088_p4 }
   0xe   :  { %p2091_p7 = pnand %p2090_p6, %p2084_p3 }
  0x10   :  { %2094 = shalt.err (!%p2091_p7)
}
  0x11   :  { %s2168_s27 = smov 256   ;;  %s2169_s28 = smov 16  }
  0x12   :  { %41 = dma.hbm_to_vmem [thread:$0]  %s2629_s5, 2048, %s36_s18, [#allocation5], %s2168_s27, %s2168_s27, %s2169_s28  }
  0x13   :  { %2161 = dma.done.wait [#allocation5], 2048  }
  0x14   :  { %2162 = vsyncadd [#allocation5], 4294965248  ;;  %v2170_v0 = vmov 0.0   ;;  %vm68_vm0 = vcmask 130048   ;;  %v1731_v1 = vld [vmem:[%s2625_s1 + $0x8] sm:$0xff]  ;;  %v59_v2 = vld [vmem:[%s2627_s3] sm:$0xff] }
  0x15   :  { %415 = vmatprep.mubr.f32.mxu0 %v2170_v0  ;;  %v60_v3 = vld [vmem:[%s2627_s3 + $0x8] sm:$0xff]  ;;  %s2171_s19 = smov 32   ;;  %v51_v5 = vld [vmem:[%s2624_s0] sm:$0xff]  ;;  %v228_v7 = vld [vmem:[#allocation4 + $0x18] sm:$0xff]  ;;  %vm223_vm1 = vcmask 261120   ;;  %vm241_vm2 = vcmask 523264  }
  0x16   :  { %220 = vrot.lane.b32.xlu0 %v1731_v1, %s2171_s19  ;;  %v1809_v4 = vpack.c.bf16 %v60_v3, %v59_v2  ;;  %v226_v6 = vld [vmem:[#allocation4 + $0x8] sm:$0xff]  ;;  %1777 = vmatprep.mubr.msk.f32.mxu1 %vm68_vm0, %v51_v5  ;;  %v225_v8 = vld [vmem:[#allocation4] sm:$0xff]  ;;  %v227_v9 = vld [vmem:[#allocation4 + $0x10] sm:$0xff] }
  0x17   :  { %v2266_v10 = vpack.c.bf16 %v228_v7, %v226_v6  ;;  %v230_v11 = vld [vmem:[#allocation4 + $0x28] sm:$0xff]  ;;  %v2271_v13 = vpack.c.bf16 %v227_v9, %v225_v8  ;;  %v232_v14 = vld [vmem:[#allocation4 + $0x38] sm:$0xff]  ;;  %v53_v15 = vld [vmem:[%s2624_s0 + $0x10] sm:$0xff] }
  0x18   :  { %1810 = vmatprep.subr.bf16.mxu1 %v1809_v4  ;;  %v52_v12 = vld [vmem:[%s2624_s0 + $0x8] sm:$0xff]  ;;  %v2277_v16 = vpack.c.bf16 %v232_v14, %v230_v11  ;;  %v229_v17 = vld [vmem:[#allocation4 + $0x20] sm:$0xff]  ;;  %v231_v18 = vld [vmem:[#allocation4 + $0x30] sm:$0xff] }
  0x19   :  { %1812 = vmatpush3.bf16.msra.mxu1 %v1809_v4  ;;  %1830 = vmatprep.subr.bf16.mxu0 %v2266_v10  ;;  %v234_v19 = vld [vmem:[#allocation4 + $0x48] sm:$0xff]  ;;  %v236_v20 = vld [vmem:[#allocation4 + $0x58] sm:$0xff]  ;;  %v2288_v22 = vpack.c.bf16 %v231_v18, %v229_v17  ;;  %v55_v23 = vld [vmem:[%s2624_s0 + $0x20] sm:$0xff] }
  0x1a   :  { %1814 = vmatprep.subr.bf16.mxu1 %v2266_v10  ;;  %1832 = vmatpush1.bf16.msra.mxu0 %v2271_v13  ;;  %v54_v21 = vld [vmem:[%s2624_s0 + $0x18] sm:$0xff]  ;;  %v2294_v24 = vpack.c.bf16 %v236_v20, %v234_v19  ;;  %v233_v25 = vld [vmem:[#allocation4 + $0x40] sm:$0xff]  ;;  %v235_v26 = vld [vmem:[#allocation4 + $0x50] sm:$0xff] }
  0x1b   :  { %1834 = vmatprep.subr.bf16.mxu0 %v2277_v16  ;;  %v214_v27 = vld [vmem:[%s2626_s2] sm:$0xff]  ;;  %v238_v28 = vld [vmem:[#allocation4 + $0x68] sm:$0xff]  ;;  %v240_v29 = vld [vmem:[#allocation4 + $0x78] sm:$0xff]  ;;  %v2308_v31 = vpack.c.bf16 %v235_v26, %v233_v25 }
  0x1c   :  { %1778 = vmatmul.mubr.msk.f32.vlgmr.msra.gmra.mrb[0].mxu1 %vm68_vm0, %v52_v12  ;;  %323 = vrot.lane.b32.xlu1 %v214_v27, %s2171_s19  ;;  %v56_v30 = vld [vmem:[%s2624_s0 + $0x28] sm:$0xff]  ;;  %v57_v32 = vld [vmem:[%s2624_s0 + $0x30] sm:$0xff]  ;;  %v2314_v33 = vpack.c.bf16 %v240_v29, %v238_v28  ;;  %v237_v34 = vld [vmem:[#allocation4 + $0x60] sm:$0xff] }
  0x1d   :  { %1816 = vmatpush1.bf16.msra.mxu1 %v2271_v13  ;;  %1780 = vmatprep.mubr.msk.f32.mxu1 %vm68_vm0, %v53_v15  ;;  %v239_v35 = vld [vmem:[#allocation4 + $0x70] sm:$0xff]  ;;  %v58_v36 = vld [vmem:[%s2624_s0 + $0x38] sm:$0xff]  ;;  %v213_v38 = vld [vmem:[%s2625_s1] sm:$0xff] }
  0x1e   :  { %1818 = vmatprep.subr.bf16.mxu1 %v2277_v16  ;;  %1836 = vmatpush1.bf16.msra.mxu0 %v2288_v22  ;;  %v2324_v37 = vpack.c.bf16 %v239_v35, %v237_v34  ;;  %v1721_v41 = vld [vmem:[%s2628_s4] ss:$0 sm:$0xff]  ;;  %s2172_s4 = smov 64   ;;  %v1732_v26 = vld [vmem:[%s2626_s2 + $0x8] sm:$0xff]  ;;  %s2173_s2 = smov 96  }
  0x1f   :  { %1838 = vmatprep.subr.bf16.mxu0 %v2294_v24  ;;  %v2380_v17 = vld [vmem:[%s2630_s6] ss:$0 sm:$0xff] }
  0x20   :  { %1781 = vmatmul.mubr.msk.f32.gmra.mrb[2].mxu1 %vm68_vm0, %v54_v21 }
  0x21   :  { %1820 = vmatpush1.bf16.msra.mxu1 %v2288_v22  ;;  %1783 = vmatprep.mubr.msk.f32.mxu1 %vm68_vm0, %v55_v23 }
  0x22   :  { %1822 = vmatprep.subr.bf16.mxu1 %v2294_v24  ;;  %1840 = vmatpush1.bf16.msra.mxu0 %v2308_v31 }
  0x23   :  { %1842 = vmatprep.subr.bf16.mxu0 %v2314_v33 }
  0x24   :  { %1784 = vmatmul.mubr.msk.f32.gmra.mrb[4].mxu1 %vm68_vm0, %v56_v30 }
  0x25   :  { %1824 = vmatpush1.bf16.msra.mxu1 %v2308_v31  ;;  %1786 = vmatprep.mubr.msk.f32.mxu1 %vm68_vm0, %v57_v32 }
  0x26   :  { %1826 = vmatprep.subr.bf16.mxu1 %v2314_v33  ;;  %1844 = vmatpush1.bf16.msra.mxu0 %v2324_v37 }
  0x27   :  { %1862 = vmatprep.subr.bf16.mxu0 %v2266_v10 }
  0x28   :  { %1787 = vmatmul.mubr.msk.f32.gmra.mrb[6].mxu1 %vm68_vm0, %v58_v36 }
  0x29   :  { %1828 = vmatpush1.bf16.msra.mxu1 %v2324_v37  ;;  %309 = vmatprep.mubr.f32.mxu1 %v2170_v0 }
  0x2a   :  { %1846 = vmatprep.subr.bf16.mxu1 %v2266_v10 }
  0x88   :  { %v221_v39 = vpop.permute.xlu0 %220 }
  0x89   :  { %v224_v40 = vsel %vm223_vm1, %v213_v38, %v221_v39 }
  0x8a   :  { %1733 = vmatmul.mubr.msk.f32.vlgmr.msra.gmra.mrb[8].mxu1 %vm241_vm2, %v224_v40 }
  0x8b   :  { %1848 = vmatpush1.bf16.msra.mxu1 %v2271_v13  ;;  %569 = vmatprep.mubr.f32.mxu1 %v2170_v0 }
  0x8c   :  { %1850 = vmatprep.subr.bf16.mxu1 %v2277_v16 }
  0x8e   :  { %v324_v5 = vpop.permute.xlu1 %323 }
  0x8f   :  { %1852 = vmatpush1.bf16.msra.mxu1 %v2288_v22 }
  0x90   :  { %1854 = vmatprep.subr.bf16.mxu1 %v2294_v24 }
  0x93   :  { %1856 = vmatpush1.bf16.msra.mxu1 %v2308_v31 }
  0x94   :  { %1858 = vmatprep.subr.bf16.mxu1 %v2314_v33 }
  0x97   :  { %1860 = vmatpush1.bf16.msra.mxu1 %v2324_v37 }
  0x98   :  { %1878 = vmatprep.subr.bf16.mxu1 %v2266_v10 }
  0xef   :  { %v1779_v42 = vpop.f32.mrb[0].mxu1 }
  0xf0   :  { %v165_v43 = vadd.f32 %v1779_v42, %v1721_v41  ;;  %v159_v44 = vpop.f32.mrb[1].mxu1 }
  0xf1   :  { %v160_v57 = vadd.f32 %v1721_v41, %v159_v44 }
  0xf3   :  { %v1782_v45 = vpop.f32.mrb[2].mxu1 }
  0xf4   :  { %v2350_v46 = vadd.f32 %v1782_v45, %v1721_v41  ;;  %v169_v47 = vpop.f32.mrb[3].mxu1 }
  0xf5   :  { %v2352_v48 = vadd.f32 %v1721_v41, %v169_v47 }
  0xf7   :  { %v1785_v49 = vpop.f32.mrb[4].mxu1 }
  0xf8   :  { %v2354_v50 = vadd.f32 %v1785_v49, %v1721_v41  ;;  %v179_v51 = vpop.f32.mrb[5].mxu1 }
  0xf9   :  { %v2356_v52 = vadd.f32 %v1721_v41, %v179_v51 }
  0xfb   :  { %v1788_v53 = vpop.f32.mrb[6].mxu1 }
  0xfc   :  { %v2358_v54 = vadd.f32 %v1788_v53, %v1721_v41  ;;  %v189_v55 = vpop.f32.mrb[7].mxu1 }
  0xfd   :  { %v2360_v56 = vadd.f32 %v1721_v41, %v189_v55 }
 0x15d   :  { %v311_v58 = vpop.f32.mrb[8].mxu1 }
 0x15e   :  { %v316_v59 = vadd.f32 %v311_v58, %v160_v57  ;;  %v313_v60 = vpop.f32.mrb[9].mxu1 }
 0x160   :  { %1977 = vtanh.f32 %v316_v59  ;;  %v317_v62 = vmul.f32 0.5, %v316_v59 }
 0x162   :  { %1979 = vtanh.f32 %v317_v62 }
 0x16a   :  { %v1978_v61 = vpop.eup %1977 }
 0x16b   :  { %328 = vrot.lane.b32.xlu0 %v1978_v61, %s2171_s19 }
 0x16c   :  { %v1980_v63 = vpop.eup %1979 }
 0x16d   :  { %v319_v1 = vmul.f32 0.5, %v1980_v63 }
 0x16f   :  { %v320_v2 = vadd.f32 0.5, %v319_v1 }
 0x171   :  { %v326_v6 = vmul.f32 %v324_v5, %v320_v2 }
 0x1dd   :  { %v329_v3 = vpop.permute.xlu0 %328 }
 0x1de   :  { %v331_v4 = vmul.f32 %v329_v3, %v320_v2 }
 0x1e0   :  { %333 = vrot.lane.b32.xlu1 %v331_v4, %s2171_s19 }
 0x252   :  { %v334_v7 = vpop.permute.xlu1 %333 }
 0x253   :  { %v336_v8 = vadd.f32 %v334_v7, %v326_v6 }
 0x255   :  { %1981 = vtanh.f32 %v336_v8 }
 0x25f   :  { %v1982_v9 = vpop.eup %1981 }
 0x260   :  { %339 = vrot.lane.b32.xlu0 %v1982_v9, %s2171_s19 }
 0x2d2   :  { %v340_v11 = vpop.permute.xlu0 %339 }
 0x2d3   :  { %v342_v12 = vmul.f32 %v340_v11, %v320_v2 }
 0x2d5   :  { %344 = vrot.lane.b32.xlu1 %v342_v12, %s2172_s4 }
 0x347   :  { %v345_v14 = vpop.permute.xlu1 %344 }
 0x348   :  { %v347_v15 = vsel %vm223_vm1, %v345_v14, %v221_v39 }
 0x349   :  { %1734 = vmatmul.mubr.msk.f32.vlgmr.msra.gmra.mrb[0].mxu0 %vm241_vm2, %v347_v15 }
 0x34a   :  { %1864 = vmatpush1.bf16.msra.mxu0 %v2271_v13  ;;  %719 = vmatprep.mubr.f32.mxu0 %v2170_v0 }
 0x34b   :  { %1866 = vmatprep.subr.bf16.mxu0 %v2277_v16 }
 0x34e   :  { %1868 = vmatpush1.bf16.msra.mxu0 %v2288_v22 }
 0x34f   :  { %1870 = vmatprep.subr.bf16.mxu0 %v2294_v24 }
 0x352   :  { %1872 = vmatpush1.bf16.msra.mxu0 %v2308_v31 }
 0x353   :  { %1874 = vmatprep.subr.bf16.mxu0 %v2314_v33 }
 0x356   :  { %1876 = vmatpush1.bf16.msra.mxu0 %v2324_v37 }
 0x357   :  { %1894 = vmatprep.subr.bf16.mxu0 %v2266_v10 }
 0x41c   :  { %v417_v18 = vpop.f32.mrb[0].mxu0 }
 0x41d   :  { %v455_v19 = vadd.f32 %v417_v18, %v165_v43  ;;  %v419_v20 = vpop.f32.mrb[1].mxu0 }
 0x41e   :  { %v422_v21 = vadd.f32 %v2380_v17, %v419_v20 }
 0x41f   :  { %1983 = vtanh.f32 %v455_v19  ;;  %v456_v27 = vmul.f32 0.5, %v455_v19 }
 0x420   :  { %1985 = vtanh.f32 %v422_v21  ;;  %v423_v28 = vmul.f32 0.5, %v422_v21 }
 0x421   :  { %1987 = vtanh.f32 %v456_v27 }
 0x422   :  { %1989 = vtanh.f32 %v423_v28 }
 0x429   :  { %v1984_v23 = vpop.eup %1983 }
 0x42a   :  { %v1986_v25 = vpop.eup %1985  ;;  %463 = vrot.lane.b32.xlu1 %v1984_v23, %s2171_s19 }
 0x42b   :  { %434 = vrot.lane.b32.xlu0 %v1986_v25, %s2171_s19  ;;  %v1988_v29 = vpop.eup %1987 }
 0x42c   :  { %v1990_v30 = vpop.eup %1989  ;;  %v458_v32 = vmul.f32 0.5, %v1988_v29 }
 0x42d   :  { %v425_v34 = vmul.f32 0.5, %v1990_v30 }
 0x42e   :  { %v459_v35 = vadd.f32 0.5, %v458_v32 }
 0x42f   :  { %429 = vrot.lane.b32.xlu0 %v1732_v26, %s2171_s19  ;;  %v426_v38 = vadd.f32 0.5, %v425_v34 }
 0x430   :  { %v461_v43 = vmul.f32 %v459_v35, %v336_v8 }
 0x49c   :  { %v464_v36 = vpop.permute.xlu1 %463 }
 0x49d   :  { %v466_v39 = vmul.f32 %v464_v36, %v459_v35  ;;  %v435_v40 = vpop.permute.xlu0 %434 }
 0x49e   :  { %v437_v41 = vmul.f32 %v435_v40, %v426_v38 }
 0x49f   :  { %468 = vrot.lane.b32.xlu0 %v466_v39, %s2171_s19 }
 0x4a0   :  { %439 = vrot.lane.b32.xlu1 %v437_v41, %s2171_s19 }
 0x4a1   :  { %v430_v42 = vpop.permute.xlu0 %429 }
 0x4a2   :  { %v432_v44 = vmul.f32 %v430_v42, %v426_v38 }
 0x511   :  { %v469_v45 = vpop.permute.xlu0 %468 }
 0x512   :  { %v471_v47 = vadd.f32 %v469_v45, %v461_v43  ;;  %v440_v49 = vpop.permute.xlu1 %439 }
 0x513   :  { %v442_v51 = vadd.f32 %v440_v49, %v432_v44 }
 0x514   :  { %1991 = vtanh.f32 %v471_v47 }
 0x515   :  { %1993 = vtanh.f32 %v442_v51 }
 0x51e   :  { %v1992_v53 = vpop.eup %1991 }
 0x51f   :  { %v1994_v55 = vpop.eup %1993  ;;  %474 = vrot.lane.b32.xlu0 %v1992_v53, %s2171_s19 }
 0x520   :  { %445 = vrot.lane.b32.xlu1 %v1994_v55, %s2171_s19 }
 0x591   :  { %v475_v57 = vpop.permute.xlu0 %474 }
 0x592   :  { %v477_v58 = vmul.f32 %v475_v57, %v459_v35  ;;  %v446_v59 = vpop.permute.xlu1 %445 }
 0x593   :  { %v2393_v60 = vmul.f32 %v446_v59, %v426_v38 }
 0x594   :  { %479 = vrot.lane.b32.xlu1 %v477_v58, %s2172_s4 }
 0x595   :  { %482 = vrot.lane.b32.xlu0 %v2393_v60, %s2173_s2 }
 0x606   :  { %v480_v61 = vpop.permute.xlu1 %479 }
 0x607   :  { %v483_v62 = vpop.permute.xlu0 %482 }
 0x608   :  { %v485_v63 = vsel %vm223_vm1, %v480_v61, %v483_v62 }
 0x609   :  { %1735 = vmatmul.mubr.msk.f32.vlgmr.msra.gmra.mrb[10].mxu1 %vm241_vm2, %v485_v63 }
 0x60a   :  { %1880 = vmatpush1.bf16.msra.mxu1 %v2271_v13  ;;  %869 = vmatprep.mubr.f32.mxu1 %v2170_v0 }
 0x60b   :  { %1882 = vmatprep.subr.bf16.mxu1 %v2277_v16 }
 0x60e   :  { %1884 = vmatpush1.bf16.msra.mxu1 %v2288_v22 }
 0x60f   :  { %1886 = vmatprep.subr.bf16.mxu1 %v2294_v24 }
 0x612   :  { %1888 = vmatpush1.bf16.msra.mxu1 %v2308_v31 }
 0x613   :  { %1890 = vmatprep.subr.bf16.mxu1 %v2314_v33 }
 0x616   :  { %1892 = vmatpush1.bf16.msra.mxu1 %v2324_v37 }
 0x617   :  { %1910 = vmatprep.subr.bf16.mxu1 %v2266_v10 }
 0x6dc   :  { %v571_v1 = vpop.f32.mrb[10].mxu1 }
 0x6dd   :  { %v605_v2 = vadd.f32 %v571_v1, %v2352_v48  ;;  %v573_v3 = vpop.f32.mrb[11].mxu1 }
 0x6de   :  { %v576_v4 = vadd.f32 %v2380_v17, %v573_v3 }
 0x6df   :  { %1995 = vtanh.f32 %v605_v2  ;;  %v606_v7 = vmul.f32 0.5, %v605_v2 }
 0x6e0   :  { %1997 = vtanh.f32 %v576_v4  ;;  %v577_v8 = vmul.f32 0.5, %v576_v4 }
 0x6e1   :  { %1999 = vtanh.f32 %v606_v7 }
 0x6e2   :  { %2001 = vtanh.f32 %v577_v8 }
 0x6e9   :  { %v1996_v5 = vpop.eup %1995 }
 0x6ea   :  { %v1998_v6 = vpop.eup %1997  ;;  %613 = vrot.lane.b32.xlu0 %v1996_v5, %s2171_s19 }
 0x6eb   :  { %584 = vrot.lane.b32.xlu1 %v1998_v6, %s2171_s19  ;;  %v2000_v9 = vpop.eup %1999 }
 0x6ec   :  { %v2002_v10 = vpop.eup %2001  ;;  %v608_v11 = vmul.f32 0.5, %v2000_v9 }
 0x6ed   :  { %v579_v12 = vmul.f32 0.5, %v2002_v10 }
 0x6ee   :  { %v609_v48 = vadd.f32 0.5, %v608_v11 }
 0x6ef   :  { %v580_v15 = vadd.f32 0.5, %v579_v12 }
 0x6f0   :  { %v611_v21 = vmul.f32 %v609_v48, %v471_v47 }
 0x6f1   :  { %v582_v25 = vmul.f32 %v580_v15, %v442_v51 }
 0x75c   :  { %v614_v14 = vpop.permute.xlu0 %613 }
 0x75d   :  { %v616_v18 = vmul.f32 %v614_v14, %v609_v48  ;;  %v585_v19 = vpop.permute.xlu1 %584 }
 0x75e   :  { %v587_v20 = vmul.f32 %v585_v19, %v580_v15 }
 0x75f   :  { %618 = vrot.lane.b32.xlu0 %v616_v18, %s2171_s19 }
 0x760   :  { %589 = vrot.lane.b32.xlu1 %v587_v20, %s2171_s19 }
 0x7d1   :  { %v619_v23 = vpop.permute.xlu0 %618 }
 0x7d2   :  { %v621_v26 = vadd.f32 %v619_v23, %v611_v21  ;;  %v590_v27 = vpop.permute.xlu1 %589 }
 0x7d3   :  { %v592_v28 = vadd.f32 %v590_v27, %v582_v25 }
 0x7d4   :  { %2003 = vtanh.f32 %v621_v26 }
 0x7d5   :  { %2005 = vtanh.f32 %v592_v28 }
 0x7de   :  { %v2004_v29 = vpop.eup %2003 }
 0x7df   :  { %v2006_v30 = vpop.eup %2005  ;;  %624 = vrot.lane.b32.xlu0 %v2004_v29, %s2171_s19 }
 0x7e0   :  { %595 = vrot.lane.b32.xlu1 %v2006_v30, %s2171_s19 }
 0x851   :  { %v625_v32 = vpop.permute.xlu0 %624 }
 0x852   :  { %v627_v34 = vmul.f32 %v625_v32, %v609_v48  ;;  %v596_v35 = vpop.permute.xlu1 %595 }
 0x853   :  { %v2417_v36 = vmul.f32 %v596_v35, %v580_v15 }
 0x854   :  { %629 = vrot.lane.b32.xlu1 %v627_v34, %s2172_s4 }
 0x855   :  { %632 = vrot.lane.b32.xlu0 %v2417_v36, %s2173_s2 }
 0x8c6   :  { %v630_v38 = vpop.permute.xlu1 %629 }
 0x8c7   :  { %v633_v39 = vpop.permute.xlu0 %632 }
 0x8c8   :  { %v635_v40 = vsel %vm223_vm1, %v630_v38, %v633_v39 }
 0x8c9   :  { %1736 = vmatmul.mubr.msk.f32.vlgmr.msra.gmra.mrb[2].mxu0 %vm241_vm2, %v635_v40 }
 0x8ca   :  { %1896 = vmatpush1.bf16.msra.mxu0 %v2271_v13  ;;  %1019 = vmatprep.mubr.f32.mxu0 %v2170_v0 }
 0x8cb   :  { %1898 = vmatprep.subr.bf16.mxu0 %v2277_v16 }
 0x8ce   :  { %1900 = vmatpush1.bf16.msra.mxu0 %v2288_v22 }
 0x8cf   :  { %1902 = vmatprep.subr.bf16.mxu0 %v2294_v24 }
 0x8d2   :  { %1904 = vmatpush1.bf16.msra.mxu0 %v2308_v31 }
 0x8d3   :  { %1906 = vmatprep.subr.bf16.mxu0 %v2314_v33 }
 0x8d6   :  { %1908 = vmatpush1.bf16.msra.mxu0 %v2324_v37 }
 0x99c   :  { %v721_v41 = vpop.f32.mrb[2].mxu0 }
 0x99d   :  { %v755_v42 = vadd.f32 %v721_v41, %v2350_v46  ;;  %v723_v43 = vpop.f32.mrb[3].mxu0 }
 0x99e   :  { %v726_v44 = vadd.f32 %v2380_v17, %v723_v43 }
 0x99f   :  { %2007 = vtanh.f32 %v755_v42  ;;  %v756_v49 = vmul.f32 0.5, %v755_v42 }
 0x9a0   :  { %2009 = vtanh.f32 %v726_v44  ;;  %v727_v51 = vmul.f32 0.5, %v726_v44 }
 0x9a1   :  { %2011 = vtanh.f32 %v756_v49 }
 0x9a2   :  { %2013 = vtanh.f32 %v727_v51 }
 0x9a9   :  { %v2008_v45 = vpop.eup %2007 }
 0x9aa   :  { %v2010_v47 = vpop.eup %2009  ;;  %763 = vrot.lane.b32.xlu0 %v2008_v45, %s2171_s19 }
 0x9ab   :  { %734 = vrot.lane.b32.xlu1 %v2010_v47, %s2171_s19  ;;  %v2012_v53 = vpop.eup %2011 }
 0x9ac   :  { %v2014_v55 = vpop.eup %2013  ;;  %v758_v57 = vmul.f32 0.5, %v2012_v53 }
 0x9ad   :  { %v729_v58 = vmul.f32 0.5, %v2014_v55 }
 0x9ae   :  { %v759_v46 = vadd.f32 0.5, %v758_v57 }
 0x9af   :  { %v730_v61 = vadd.f32 0.5, %v729_v58 }
 0x9b0   :  { %v761_v2 = vmul.f32 %v759_v46, %v621_v26 }
 0x9b1   :  { %v732_v4 = vmul.f32 %v730_v61, %v592_v28 }
 0xa1c   :  { %v764_v59 = vpop.permute.xlu0 %763 }
 0xa1d   :  { %v766_v62 = vmul.f32 %v764_v59, %v759_v46  ;;  %v735_v63 = vpop.permute.xlu1 %734 }
 0xa1e   :  { %v737_v1 = vmul.f32 %v735_v63, %v730_v61 }
 0xa1f   :  { %768 = vrot.lane.b32.xlu0 %v766_v62, %s2171_s19 }
 0xa20   :  { %739 = vrot.lane.b32.xlu1 %v737_v1, %s2171_s19 }
 0xa91   :  { %v769_v3 = vpop.permute.xlu0 %768 }
 0xa92   :  { %v771_v5 = vadd.f32 %v769_v3, %v761_v2  ;;  %v740_v6 = vpop.permute.xlu1 %739 }
 0xa93   :  { %v742_v7 = vadd.f32 %v740_v6, %v732_v4 }
 0xa94   :  { %2015 = vtanh.f32 %v771_v5 }
 0xa95   :  { %2017 = vtanh.f32 %v742_v7 }
 0xa9e   :  { %v2016_v8 = vpop.eup %2015 }
 0xa9f   :  { %v2018_v9 = vpop.eup %2017  ;;  %774 = vrot.lane.b32.xlu0 %v2016_v8, %s2171_s19 }
 0xaa0   :  { %745 = vrot.lane.b32.xlu1 %v2018_v9, %s2171_s19 }
 0xb11   :  { %v775_v10 = vpop.permute.xlu0 %774 }
 0xb12   :  { %v777_v11 = vmul.f32 %v775_v10, %v759_v46  ;;  %v746_v12 = vpop.permute.xlu1 %745 }
 0xb13   :  { %v2440_v48 = vmul.f32 %v746_v12, %v730_v61 }
 0xb14   :  { %779 = vrot.lane.b32.xlu1 %v777_v11, %s2172_s4 }
 0xb15   :  { %782 = vrot.lane.b32.xlu0 %v2440_v48, %s2173_s2 }
 0xb86   :  { %v780_v14 = vpop.permute.xlu1 %779 }
 0xb87   :  { %v783_v15 = vpop.permute.xlu0 %782 }
 0xb88   :  { %v785_v18 = vsel %vm223_vm1, %v780_v14, %v783_v15 }
 0xb89   :  { %1737 = vmatmul.mubr.msk.f32.vlgmr.msra.gmra.mrb[12].mxu1 %vm241_vm2, %v785_v18 }
 0xb8a   :  { %1912 = vmatpush1.bf16.msra.mxu1 %v2271_v13  ;;  %1169 = vmatprep.mubr.f32.mxu1 %v2170_v0 }
 0xb8b   :  { %1914 = vmatprep.subr.bf16.mxu1 %v2277_v16 }
 0xb8e   :  { %1916 = vmatpush1.bf16.msra.mxu1 %v2288_v22 }
 0xb8f   :  { %1918 = vmatprep.subr.bf16.mxu1 %v2294_v24 }
 0xb92   :  { %1920 = vmatpush1.bf16.msra.mxu1 %v2308_v31 }
 0xb93   :  { %1922 = vmatprep.subr.bf16.mxu1 %v2314_v33 }
 0xb96   :  { %1924 = vmatpush1.bf16.msra.mxu1 %v2324_v37 }
 0xc5c   :  { %v871_v19 = vpop.f32.mrb[12].mxu1 }
 0xc5d   :  { %v905_v20 = vadd.f32 %v871_v19, %v2356_v52  ;;  %v873_v21 = vpop.f32.mrb[13].mxu1 }
 0xc5e   :  { %v876_v13 = vadd.f32 %v2380_v17, %v873_v21 }
 0xc5f   :  { %2019 = vtanh.f32 %v905_v20  ;;  %v906_v22 = vmul.f32 0.5, %v905_v20 }
 0xc60   :  { %2021 = vtanh.f32 %v876_v13  ;;  %v877_v24 = vmul.f32 0.5, %v876_v13 }
 0xc61   :  { %2023 = vtanh.f32 %v906_v22 }
 0xc62   :  { %2025 = vtanh.f32 %v877_v24 }
 0xc69   :  { %v2020_v23 = vpop.eup %2019 }
 0xc6a   :  { %v2022_v16 = vpop.eup %2021  ;;  %913 = vrot.lane.b32.xlu0 %v2020_v23, %s2171_s19 }
 0xc6b   :  { %884 = vrot.lane.b32.xlu1 %v2022_v16, %s2171_s19  ;;  %v2024_v31 = vpop.eup %2023 }
 0xc6c   :  { %v2026_v25 = vpop.eup %2025  ;;  %v908_v26 = vmul.f32 0.5, %v2024_v31 }
 0xc6d   :  { %v879_v27 = vmul.f32 0.5, %v2026_v25 }
 0xc6e   :  { %v909_v52 = vadd.f32 0.5, %v908_v26 }
 0xc6f   :  { %v880_v29 = vadd.f32 0.5, %v879_v27 }
 0xc70   :  { %v911_v35 = vmul.f32 %v909_v52, %v771_v5 }
 0xc71   :  { %v882_v39 = vmul.f32 %v880_v29, %v742_v7 }
 0xcdc   :  { %v914_v28 = vpop.permute.xlu0 %913 }
 0xcdd   :  { %v916_v30 = vmul.f32 %v914_v28, %v909_v52  ;;  %v885_v32 = vpop.permute.xlu1 %884 }
 0xcde   :  { %v887_v34 = vmul.f32 %v885_v32, %v880_v29 }
 0xcdf   :  { %918 = vrot.lane.b32.xlu0 %v916_v30, %s2171_s19 }
 0xce0   :  { %889 = vrot.lane.b32.xlu1 %v887_v34, %s2171_s19 }
 0xd51   :  { %v919_v38 = vpop.permute.xlu0 %918 }
 0xd52   :  { %v921_v40 = vadd.f32 %v919_v38, %v911_v35  ;;  %v890_v41 = vpop.permute.xlu1 %889 }
 0xd53   :  { %v892_v42 = vadd.f32 %v890_v41, %v882_v39 }
 0xd54   :  { %2027 = vtanh.f32 %v921_v40 }
 0xd55   :  { %2029 = vtanh.f32 %v892_v42 }
 0xd5e   :  { %v2028_v43 = vpop.eup %2027 }
 0xd5f   :  { %v2030_v44 = vpop.eup %2029  ;;  %924 = vrot.lane.b32.xlu0 %v2028_v43, %s2171_s19 }
 0xd60   :  { %895 = vrot.lane.b32.xlu1 %v2030_v44, %s2171_s19 }
 0xdd1   :  { %v925_v45 = vpop.permute.xlu0 %924 }
 0xdd2   :  { %v927_v47 = vmul.f32 %v925_v45, %v909_v52  ;;  %v896_v49 = vpop.permute.xlu1 %895 }
 0xdd3   :  { %v2463_v51 = vmul.f32 %v896_v49, %v880_v29 }
 0xdd4   :  { %929 = vrot.lane.b32.xlu1 %v927_v47, %s2172_s4 }
 0xdd5   :  { %932 = vrot.lane.b32.xlu0 %v2463_v51, %s2173_s2 }
 0xe46   :  { %v930_v53 = vpop.permute.xlu1 %929 }
 0xe47   :  { %v933_v55 = vpop.permute.xlu0 %932 }
 0xe48   :  { %v935_v57 = vsel %vm223_vm1, %v930_v53, %v933_v55 }
 0xe49   :  { %1738 = vmatmul.mubr.msk.f32.vlgmr.msra.gmra.mrb[4].mxu0 %vm241_vm2, %v935_v57 }
 0xe4a   :  { %1319 = vmatprep.mubr.f32.mxu0 %v2170_v0 }
 0xf1c   :  { %v1021_v58 = vpop.f32.mrb[4].mxu0 }
 0xf1d   :  { %v1055_v46 = vadd.f32 %v1021_v58, %v2354_v50  ;;  %v1023_v59 = vpop.f32.mrb[5].mxu0 }
 0xf1e   :  { %v1026_v61 = vadd.f32 %v2380_v17, %v1023_v59  ;;  %v1239_v59 = vld [vmem:[#allocation4 + $0x18] sm:$0xff] }
 0xf1f   :  { %2031 = vtanh.f32 %v1055_v46  ;;  %v1056_v1 = vmul.f32 0.5, %v1055_v46  ;;  %v1237_v46 = vld [vmem:[#allocation4 + $0x8] sm:$0xff] }
 0xf20   :  { %2033 = vtanh.f32 %v1026_v61  ;;  %v1027_v2 = vmul.f32 0.5, %v1026_v61  ;;  %v1236_v61 = vld [vmem:[#allocation4] sm:$0xff] }
 0xf21   :  { %2035 = vtanh.f32 %v1056_v1  ;;  %v1241_v1 = vld [vmem:[#allocation4 + $0x28] sm:$0xff] }
 0xf22   :  { %2037 = vtanh.f32 %v1027_v2  ;;  %v1243_v2 = vld [vmem:[#allocation4 + $0x38] sm:$0xff] }
 0xf29   :  { %v2032_v62 = vpop.eup %2031 }
 0xf2a   :  { %v2034_v63 = vpop.eup %2033  ;;  %1063 = vrot.lane.b32.xlu0 %v2032_v62, %s2171_s19  ;;  %v1925_v62 = vpack.c.bf16 %v1239_v59, %v1237_v46 }
 0xf2b   :  { %1034 = vrot.lane.b32.xlu1 %v2034_v63, %s2171_s19  ;;  %v2036_v3 = vpop.eup %2035  ;;  %v1238_v63 = vld [vmem:[#allocation4 + $0x10] sm:$0xff] }
 0xf2c   :  { %v2038_v4 = vpop.eup %2037  ;;  %v1058_v5 = vmul.f32 0.5, %v2036_v3  ;;  %v1927_v3 = vpack.c.bf16 %v1238_v63, %v1236_v61  ;;  %1926 = vmatprep.subr.bf16.mxu0 %v1925_v62  ;;  %1942 = vmatprep.subr.bf16.mxu1 %v1925_v62 }
 0xf2d   :  { %v1029_v6 = vmul.f32 0.5, %v2038_v4  ;;  %v1929_v4 = vpack.c.bf16 %v1243_v2, %v1241_v1 }
 0xf2e   :  { %v1059_v50 = vadd.f32 0.5, %v1058_v5  ;;  %v1240_v5 = vld [vmem:[#allocation4 + $0x20] sm:$0xff]  ;;  %1928 = vmatpush1.bf16.msra.mxu0 %v1927_v3 }
 0xf2f   :  { %v1030_v8 = vadd.f32 0.5, %v1029_v6  ;;  %v1242_v6 = vld [vmem:[#allocation4 + $0x30] sm:$0xff]  ;;  %1930 = vmatprep.subr.bf16.mxu0 %v1929_v4 }
 0xf30   :  { %v1061_v12 = vmul.f32 %v1059_v50, %v921_v40 }
 0xf31   :  { %v1032_v15 = vmul.f32 %v1030_v8, %v892_v42 }
 0xf9c   :  { %v1064_v7 = vpop.permute.xlu0 %1063 }
 0xf9d   :  { %v1066_v9 = vmul.f32 %v1064_v7, %v1059_v50  ;;  %v1035_v10 = vpop.permute.xlu1 %1034  ;;  %v1247_v7 = vld [vmem:[#allocation4 + $0x58] sm:$0xff] }
 0xf9e   :  { %v1037_v11 = vmul.f32 %v1035_v10, %v1030_v8  ;;  %v1244_v10 = vld [vmem:[#allocation4 + $0x40] sm:$0xff] }
 0xf9f   :  { %1068 = vrot.lane.b32.xlu0 %v1066_v9, %s2171_s19 }
 0xfa0   :  { %1039 = vrot.lane.b32.xlu1 %v1037_v11, %s2171_s19  ;;  %v1246_v11 = vld [vmem:[#allocation4 + $0x50] sm:$0xff] }
0x1011   :  { %v1069_v14 = vpop.permute.xlu0 %1068 }
0x1012   :  { %v1071_v18 = vadd.f32 %v1069_v14, %v1061_v12  ;;  %v1040_v19 = vpop.permute.xlu1 %1039  ;;  %v1935_v12 = vpack.c.bf16 %v1246_v11, %v1244_v10 }
0x1013   :  { %v1042_v20 = vadd.f32 %v1040_v19, %v1032_v15 }
0x1014   :  { %2039 = vtanh.f32 %v1071_v18 }
0x1015   :  { %2041 = vtanh.f32 %v1042_v20 }
0x101e   :  { %v2040_v21 = vpop.eup %2039 }
0x101f   :  { %v2042_v13 = vpop.eup %2041  ;;  %1074 = vrot.lane.b32.xlu0 %v2040_v21, %s2171_s19 }
0x1020   :  { %1045 = vrot.lane.b32.xlu1 %v2042_v13, %s2171_s19 }
0x1091   :  { %v1075_v23 = vpop.permute.xlu0 %1074 }
0x1092   :  { %v1077_v16 = vmul.f32 %v1075_v23, %v1059_v50  ;;  %v1046_v22 = vpop.permute.xlu1 %1045  ;;  %v1245_v50 = vld [vmem:[#allocation4 + $0x48] sm:$0xff] }
0x1093   :  { %v2479_v24 = vmul.f32 %v1046_v22, %v1030_v8  ;;  %v1931_v8 = vpack.c.bf16 %v1242_v6, %v1240_v5  ;;  %v1933_v9 = vpack.c.bf16 %v1247_v7, %v1245_v50 }
0x1094   :  { %1079 = vrot.lane.b32.xlu1 %v1077_v16, %s2172_s4 }
0x1095   :  { %1082 = vrot.lane.b32.xlu0 %v2479_v24, %s2173_s2  ;;  %1932 = vmatpush1.bf16.msra.mxu0 %v1931_v8 }
0x1096   :  { %1934 = vmatprep.subr.bf16.mxu0 %v1933_v9 }
0x1099   :  { %1936 = vmatpush1.bf16.msra.mxu0 %v1935_v12 }
0x109a   :  { %1938 = vmatprep.subr.bf16.mxu0 %v2314_v33 }
0x109d   :  { %1940 = vmatpush1.bf16.msra.mxu0 %v2324_v37 }
0x1106   :  { %v1080_v31 = vpop.permute.xlu1 %1079 }
0x1107   :  { %v1083_v25 = vpop.permute.xlu0 %1082 }
0x1108   :  { %v1085_v26 = vsel %vm223_vm1, %v1080_v31, %v1083_v25 }
0x1109   :  { %1739 = vmatmul.mubr.msk.f32.vlgmr.msra.gmra.mrb[14].mxu1 %vm241_vm2, %v1085_v26 }
0x110a   :  { %1469 = vmatprep.mubr.f32.mxu1 %v2170_v0  ;;  %1944 = vmatpush1.bf16.msra.mxu1 %v1927_v3 }
0x110b   :  { %1946 = vmatprep.subr.bf16.mxu1 %v1929_v4 }
0x110e   :  { %1948 = vmatpush1.bf16.msra.mxu1 %v1931_v8 }
0x110f   :  { %1950 = vmatprep.subr.bf16.mxu1 %v1933_v9 }
0x1112   :  { %1952 = vmatpush1.bf16.msra.mxu1 %v1935_v12 }
0x11dc   :  { %v1171_v27 = vpop.f32.mrb[14].mxu1 }
0x11dd   :  { %v1205_v52 = vadd.f32 %v1171_v27, %v2360_v56  ;;  %v1173_v28 = vpop.f32.mrb[15].mxu1 }
0x11de   :  { %v1176_v29 = vadd.f32 %v2380_v17, %v1173_v28 }
0x11df   :  { %2043 = vtanh.f32 %v1205_v52  ;;  %v1206_v34 = vmul.f32 0.5, %v1205_v52 }
0x11e0   :  { %2045 = vtanh.f32 %v1176_v29  ;;  %v1177_v35 = vmul.f32 0.5, %v1176_v29 }
0x11e1   :  { %2047 = vtanh.f32 %v1206_v34 }
0x11e2   :  { %2049 = vtanh.f32 %v1177_v35 }
0x11e9   :  { %v2044_v30 = vpop.eup %2043 }
0x11ea   :  { %v2046_v32 = vpop.eup %2045  ;;  %1213 = vrot.lane.b32.xlu0 %v2044_v30, %s2171_s19 }
0x11eb   :  { %1184 = vrot.lane.b32.xlu1 %v2046_v32, %s2171_s19  ;;  %v2048_v38 = vpop.eup %2047 }
0x11ec   :  { %v2050_v0 = vpop.eup %2049  ;;  %v1208_v39 = vmul.f32 0.5, %v2048_v38 }
0x11ed   :  { %v1179_v40 = vmul.f32 0.5, %v2050_v0 }
0x11ee   :  { %v1209_v56 = vadd.f32 0.5, %v1208_v39 }
0x11ef   :  { %v1180_v42 = vadd.f32 0.5, %v1179_v40 }
0x11f0   :  { %v1211_v47 = vmul.f32 %v1209_v56, %v1071_v18 }
0x11f1   :  { %v1182_v53 = vmul.f32 %v1180_v42, %v1042_v20 }
0x125c   :  { %v1214_v41 = vpop.permute.xlu0 %1213 }
0x125d   :  { %v1216_v43 = vmul.f32 %v1214_v41, %v1209_v56  ;;  %v1185_v44 = vpop.permute.xlu1 %1184 }
0x125e   :  { %v1187_v45 = vmul.f32 %v1185_v44, %v1180_v42 }
0x125f   :  { %1218 = vrot.lane.b32.xlu0 %v1216_v43, %s2171_s19 }
0x1260   :  { %1189 = vrot.lane.b32.xlu1 %v1187_v45, %s2171_s19  ;;  %v1399_v45 = vld [vmem:[#allocation4 + $0x68] sm:$0xff] }
0x12d1   :  { %v1219_v49 = vpop.permute.xlu0 %1218 }
0x12d2   :  { %v2493_v55 = vadd.f32 %v1219_v49, %v1211_v47  ;;  %v1190_v57 = vpop.permute.xlu1 %1189  ;;  %v1401_v47 = vld [vmem:[#allocation4 + $0x78] sm:$0xff]  ;;  %v1398_v49 = vld [vmem:[#allocation4 + $0x60] sm:$0xff] }
0x12d3   :  { %v2495_v58 = vadd.f32 %v1190_v57, %v1182_v53  ;;  %v1953_v53 = vpack.c.bf16 %v1401_v47, %v1399_v45  ;;  %v1400_v57 = vld [vmem:[#allocation4 + $0x70] sm:$0xff] }
0x12d4   :  { %2051 = vtanh.f32 %v2493_v55  ;;  %v1955_v46 = vpack.c.bf16 %v1400_v57, %v1398_v49 }
0x12d5   :  { %2053 = vtanh.f32 %v2495_v58  ;;  %1954 = vmatprep.subr.bf16.mxu1 %v1953_v53 }
0x12d6   :  { %1956 = vmatpush1.bf16.msra.mxu1 %v1955_v46 }
0x12de   :  { %v2052_v14 = vpop.eup %2051 }
0x12df   :  { %v2054_v15 = vpop.eup %2053  ;;  %1224 = vrot.lane.b32.xlu0 %v2052_v14, %s2171_s19 }
0x12e0   :  { %1195 = vrot.lane.b32.xlu1 %v2054_v15, %s2171_s19 }
0x1351   :  { %v1225_v18 = vpop.permute.xlu0 %1224 }
0x1352   :  { %v1227_v19 = vmul.f32 %v1225_v18, %v1209_v56  ;;  %v1196_v20 = vpop.permute.xlu1 %1195  ;;  %v1525_v18 = vld [vmem:[%s2631_s7] sm:$0xff] }
0x1353   :  { %v2503_v21 = vmul.f32 %v1196_v20, %v1180_v42  ;;  %v1528_v20 = vld [vmem:[%s2631_s7 + $0x18] sm:$0xff] }
0x1354   :  { %1229 = vrot.lane.b32.xlu1 %v1227_v19, %s2172_s4 }
0x1355   :  { %1232 = vrot.lane.b32.xlu0 %v2503_v21, %s2173_s2 }
0x13c6   :  { %v1230_v13 = vpop.permute.xlu1 %1229 }
0x13c7   :  { %v1233_v23 = vpop.permute.xlu0 %1232 }
0x13c8   :  { %v1235_v16 = vsel %vm223_vm1, %v1230_v13, %v1233_v23 }
0x13c9   :  { %1740 = vmatmul.mubr.msk.f32.vlgmr.msra.gmra.mrb[6].mxu0 %vm241_vm2, %v1235_v16 }
0x149c   :  { %v1321_v22 = vpop.f32.mrb[6].mxu0 }
0x149d   :  { %v1355_v33 = vadd.f32 %v1321_v22, %v2358_v54  ;;  %v1323_v37 = vpop.f32.mrb[7].mxu0 }
0x149e   :  { %v1326_v31 = vadd.f32 %v2380_v17, %v1323_v37 }
0x149f   :  { %2055 = vtanh.f32 %v1355_v33  ;;  %v1356_v27 = vmul.f32 0.5, %v1355_v33 }
0x14a0   :  { %2057 = vtanh.f32 %v1326_v31  ;;  %v1327_v52 = vmul.f32 0.5, %v1326_v31 }
0x14a1   :  { %2059 = vtanh.f32 %v1356_v27 }
0x14a2   :  { %2061 = vtanh.f32 %v1327_v52 }
0x14a9   :  { %v2056_v25 = vpop.eup %2055 }
0x14aa   :  { %v2058_v26 = vpop.eup %2057  ;;  %1363 = vrot.lane.b32.xlu0 %v2056_v25, %s2171_s19 }
0x14ab   :  { %1334 = vrot.lane.b32.xlu1 %v2058_v26, %s2171_s19  ;;  %v2060_v28 = vpop.eup %2059 }
0x14ac   :  { %v2062_v29 = vpop.eup %2061  ;;  %v1358_v30 = vmul.f32 0.5, %v2060_v28 }
0x14ad   :  { %v1329_v32 = vmul.f32 0.5, %v2062_v29 }
0x14ae   :  { %v1359_v54 = vadd.f32 0.5, %v1358_v30 }
0x14af   :  { %v1330_v35 = vadd.f32 0.5, %v1329_v32 }
0x14b0   :  { %v1361_v40 = vmul.f32 %v1359_v54, %v2493_v55 }
0x14b1   :  { %v1332_v41 = vmul.f32 %v1330_v35, %v2495_v58 }
0x151c   :  { %v1364_v34 = vpop.permute.xlu0 %1363 }
0x151d   :  { %v1366_v38 = vmul.f32 %v1364_v34, %v1359_v54  ;;  %v1335_v0 = vpop.permute.xlu1 %1334 }
0x151e   :  { %v1337_v39 = vmul.f32 %v1335_v0, %v1330_v35 }
0x151f   :  { %1368 = vrot.lane.b32.xlu0 %v1366_v38, %s2171_s19 }
0x1520   :  { %1339 = vrot.lane.b32.xlu1 %v1337_v39, %s2171_s19 }
0x1591   :  { %v1369_v56 = vpop.permute.xlu0 %1368 }
0x1592   :  { %v1371_v42 = vadd.f32 %v1369_v56, %v1361_v40  ;;  %v1340_v43 = vpop.permute.xlu1 %1339 }
0x1593   :  { %v1342_v44 = vadd.f32 %v1340_v43, %v1332_v41 }
0x1594   :  { %2063 = vtanh.f32 %v1371_v42 }
0x1595   :  { %2065 = vtanh.f32 %v1342_v44 }
0x159e   :  { %v2064_v59 = vpop.eup %2063 }
0x159f   :  { %v2066_v61 = vpop.eup %2065  ;;  %1374 = vrot.lane.b32.xlu0 %v2064_v59, %s2171_s19 }
0x15a0   :  { %1345 = vrot.lane.b32.xlu1 %v2066_v61, %s2171_s19 }
0x1611   :  { %v1375_v55 = vpop.permute.xlu0 %1374 }
0x1612   :  { %v1377_v58 = vmul.f32 %v1375_v55, %v1359_v54  ;;  %v1346_v62 = vpop.permute.xlu1 %1345 }
0x1613   :  { %v1348_v63 = vmul.f32 %v1346_v62, %v1330_v35 }
0x1614   :  { %1379 = vrot.lane.b32.xlu1 %v1377_v58, %s2172_s4 }
0x1615   :  { %1382 = vrot.lane.b32.xlu0 %v1348_v63, %s2173_s2 }
0x1686   :  { %v1380_v1 = vpop.permute.xlu1 %1379 }
0x1687   :  { %1503 = vst.msk [vmem:[#allocation8] sm:$0xff] %vm223_vm1, %v1380_v1  ;;  %v1383_v2 = vpop.permute.xlu0 %1382 }
0x1688   :  { %v1385_v3 = vsel %vm223_vm1, %v1380_v1, %v1383_v2 }
0x1689   :  { %1741 = vmatmul.mubr.msk.f32.vlgmr.msra.gmra.mrb[16].mxu1 %vm241_vm2, %v1385_v3 }
0x175c   :  { %v1471_v4 = vpop.f32.mrb[16].mxu1 }
0x175d   :  { %v1472_v5 = vpop.f32.mrb[17].mxu1 }
0x175e   :  { %v1475_v6 = vadd.f32 %v2380_v17, %v1472_v5 }
0x1760   :  { %2067 = vtanh.f32 %v1475_v6  ;;  %v1476_v7 = vmul.f32 0.5, %v1475_v6 }
0x1762   :  { %2069 = vtanh.f32 %v1476_v7 }
0x176a   :  { %v2068_v50 = vpop.eup %2067 }
0x176b   :  { %1483 = vrot.lane.b32.xlu1 %v2068_v50, %s2171_s19 }
0x176c   :  { %v2070_v8 = vpop.eup %2069 }
0x176d   :  { %v1478_v9 = vmul.f32 0.5, %v2070_v8 }
0x176f   :  { %v1479_v10 = vadd.f32 0.5, %v1478_v9 }
0x1771   :  { %v1481_v17 = vmul.f32 %v1479_v10, %v1342_v44 }
0x17dd   :  { %v1484_v11 = vpop.permute.xlu1 %1483 }
0x17de   :  { %v1486_v12 = vmul.f32 %v1484_v11, %v1479_v10 }
0x17e0   :  { %1488 = vrot.lane.b32.xlu0 %v1486_v12, %s2171_s19 }
0x17e4   :  { %450 = vrot.lane.b32.xlu0 %v2393_v60, %s2172_s4  ;;  %v1526_v60 = vld [vmem:[%s2631_s7 + $0x8] sm:$0xff] }
0x17e8   :  { %750 = vrot.lane.b32.xlu0 %v2440_v48, %s2172_s4  ;;  %v1957_v48 = vpack.c.bf16 %v1526_v60, %v1525_v18 }
0x17ea   :  { %1958 = vmatprep.subr.bf16.mxu0 %v1957_v48 }
0x17eb   :  { %1960 = vmatpush3.bf16.msra.mxu0 %v1957_v48 }
0x17ec   :  { %1050 = vrot.lane.b32.xlu0 %v2479_v24, %s2172_s4  ;;  %v1527_v24 = vld [vmem:[%s2631_s7 + $0x10] sm:$0xff]  ;;  %s2174_s7 = smov [#allocation8]  }
0x17ed   :  { %v1961_v13 = vpack.c.bf16 %v1528_v20, %v1527_v24 }
0x17ef   :  { %1962 = vmatprep.subr.bf16.mxu0 %v1961_v13 }
0x17f0   :  { %1350 = vrot.lane.b32.xlu0 %v1348_v63, %s2172_s4  ;;  %1964 = vmatpush3.bf16.msra.mxu0 %v1961_v13 }
0x17f4   :  { %1507 = vrot.lane.b32.xlu0 %v1371_v42, %s2173_s2 }
0x1852   :  { %v1489_v14 = vpop.permute.xlu0 %1488 }
0x1853   :  { %v1491_v15 = vadd.f32 %v1489_v14, %v1481_v17 }
0x1855   :  { %2071 = vtanh.f32 %v1491_v15 }
0x1856   :  { %v451_v19 = vpop.permute.xlu0 %450 }
0x1857   :  { %453 = vst.msk [vmem:[#allocation3] sm:$0xff] %vm223_vm1, %v451_v19 }
0x185a   :  { %v751_v23 = vpop.permute.xlu0 %750 }
0x185b   :  { %753 = vst.msk [vmem:[#allocation3 + $0x10] sm:$0xff] %vm223_vm1, %v751_v23 }
0x185e   :  { %v1051_v16 = vpop.permute.xlu0 %1050  ;;  %v1517_v22 = vld [vmem:[#allocation3] sm:$0xff] }
0x185f   :  { %v2072_v33 = vpop.eup %2071  ;;  %1053 = vst.msk [vmem:[#allocation3 + $0x20] sm:$0xff] %vm223_vm1, %v1051_v16  ;;  %1797 = vmatprep.mubr.msk.f32.mxu0 %vm223_vm1, %v1517_v22 }
0x1860   :  { %1494 = vrot.lane.b32.xlu1 %v2072_v33, %s2171_s19  ;;  %s1690_s19 = sshll.u32 %s2174_s7, 4  ;;  %s1691_s19 = int_to_ptr.vmem [resolvable:$true] %s1690_s19 }
0x1861   :  { %s2095_s28 = scalar_lea.vmem %s1691_s19, 256  ;;  %p2100_p9 = scmp.lt.s32.totalorder %s1691_s19, %s1691_s19 }
0x1862   :  { %v1351_v37 = vpop.permute.xlu0 %1350  ;;  %p2096_p8 = scmp.ne.s32.totalorder %s1691_s19, %s2095_s28  ;;  %p2101_p10 = scmp.lt.s32.totalorder %s2095_s28, %s2095_s28 }
0x1863   :  { %1353 = vst.msk [vmem:[#allocation3 + $0x30] sm:$0xff] %vm223_vm1, %v1351_v37 }
0x1864   :  { %600 = vrot.lane.b32.xlu1 %v2417_v36, %s2172_s4  ;;  %p2102_p11 = por %p2101_p10, %p2100_p9 }
0x1866   :  { %v1508_v31 = vpop.permute.xlu0 %1507  ;;  %v1521_v29 = vld [vmem:[#allocation3 + $0x20] sm:$0xff]  ;;  %p2103_p12 = pnand %p2102_p11, %p2096_p8 }
0x1867   :  { %1510 = vst.msk [vmem:[#allocation10] sm:$0xff] %vm223_vm1, %v1508_v31 }
0x1868   :  { %900 = vrot.lane.b32.xlu1 %v2463_v51, %s2172_s4  ;;  %v1519_v51 = vld [vmem:[#allocation3 + $0x10] sm:$0xff] }
0x186a   :  { %v1523_v32 = vld [vmem:[#allocation3 + $0x30] sm:$0xff] }
0x186c   :  { %1200 = vrot.lane.b32.xlu1 %v2503_v21, %s2172_s4 }
0x18d2   :  { %v1495_v25 = vpop.permute.xlu1 %1494 }
0x18d3   :  { %v1497_v26 = vmul.f32 %v1495_v25, %v1479_v10 }
0x18d5   :  { %1499 = vrot.lane.b32.xlu1 %v1497_v26, %s2172_s4 }
0x18d6   :  { %v601_v27 = vpop.permute.xlu1 %600 }
0x18d7   :  { %603 = vst.msk [vmem:[#allocation3 + $0x8] sm:$0xff] %vm223_vm1, %v601_v27 }
0x18d9   :  { %1512 = vrot.lane.b32.xlu1 %v1491_v15, %s2173_s2 }
0x18da   :  { %v901_v52 = vpop.permute.xlu1 %900 }
0x18db   :  { %903 = vst.msk [vmem:[#allocation3 + $0x18] sm:$0xff] %vm223_vm1, %v901_v52 }
0x18de   :  { %v1201_v36 = vpop.permute.xlu1 %1200  ;;  %v1518_v28 = vld [vmem:[#allocation3 + $0x8] sm:$0xff] }
0x18df   :  { %1203 = vst.msk [vmem:[#allocation3 + $0x28] sm:$0xff] %vm223_vm1, %v1201_v36  ;;  %1798 = vmatmul.mubr.msk.f32.vlgmr.msra.gmra.mrb[8].mxu0 %vm223_vm1, %v1518_v28 }
0x18e0   :  { %1800 = vmatprep.mubr.msk.f32.mxu0 %vm223_vm1, %v1519_v51 }
0x18e2   :  { %v1520_v21 = vld [vmem:[#allocation3 + $0x18] sm:$0xff] }
0x18e3   :  { %1801 = vmatmul.mubr.msk.f32.gmra.mrb[10].mxu0 %vm223_vm1, %v1520_v21 }
0x18e4   :  { %1803 = vmatprep.mubr.msk.f32.mxu0 %vm223_vm1, %v1521_v29 }
0x18e6   :  { %v1522_v30 = vld [vmem:[#allocation3 + $0x28] sm:$0xff] }
0x18e7   :  { %1804 = vmatmul.mubr.msk.f32.gmra.mrb[12].mxu0 %vm223_vm1, %v1522_v30 }
0x18e8   :  { %1806 = vmatprep.mubr.msk.f32.mxu0 %vm223_vm1, %v1523_v32 }
0x1947   :  { %v1500_v54 = vpop.permute.xlu1 %1499 }
0x1948   :  { %1502 = vst.msk [vmem:[#allocation3 + $0x38] sm:$0xff] %vm223_vm1, %v1500_v54  ;;  %1505 = vst.msk [vmem:[#allocation8 + $0x8] sm:$0xff] %vm223_vm1, %v1500_v54 }
0x194b   :  { %v1513_v34 = vpop.permute.xlu1 %1512 }
0x194c   :  { %1516 = vst.msk [vmem:[#allocation10 + $0x8] sm:$0xff] %vm223_vm1, %v1513_v34 }
0x194f   :  { %v1524_v35 = vld [vmem:[#allocation3 + $0x38] sm:$0xff] }
0x1950   :  { %1807 = vmatmul.mubr.msk.f32.gmra.mrb[14].mxu0 %vm223_vm1, %v1524_v35 }
0x1951   :  { %2106 = shalt.err (!%p2103_p12)
}
0x1952   :  { %s2107_s12 = scalar_lea.hbm %s2634_s10, 256 }
0x1953   :  { %p2108_p13 = scmp.ne.s32.totalorder %s2634_s10, %s2107_s12  ;;  %p2111_p0 = scmp.lt.u32.totalorder %s2107_s12, %s2634_s10 }
0x1955   :  { %p2113_p1 = pnand %p2111_p0, %p2108_p13 }
0x1957   :  { %2116 = shalt.err (!%p2113_p1)
}
0x1958   :  { %s2175_s17 = smov 128   ;;  %s2176_s0 = smov 8  }
0x1959   :  { %1696 = dma.vmem_to_hbm [thread:$0]  %s1691_s19, 256, %s2634_s10, [#allocation9], %s2175_s17, %s2175_s17, %s2176_s0  }
0x195a   :  { %s2177_s5 = smov [#allocation10]  }
0x195b   :  { %s1702_s18 = sshll.u32 %s2177_s5, 4  ;;  %s1703_s18 = int_to_ptr.vmem [resolvable:$true] %s1702_s18 }
0x195c   :  { %s2117_s3 = scalar_lea.vmem %s1703_s18, 256  ;;  %p2122_p3 = scmp.lt.s32.totalorder %s1703_s18, %s1703_s18 }
0x195d   :  { %p2118_p2 = scmp.ne.s32.totalorder %s1703_s18, %s2117_s3  ;;  %p2123_p4 = scmp.lt.s32.totalorder %s2117_s3, %s2117_s3 }
0x195f   :  { %p2124_p5 = por %p2123_p4, %p2122_p3 }
0x1961   :  { %p2125_p6 = pnand %p2124_p5, %p2118_p2 }
0x1963   :  { %2128 = shalt.err (!%p2125_p6)
}
0x1964   :  { %s2129_s6 = scalar_lea.hbm %s2635_s11, 256 }
0x1965   :  { %p2130_p7 = scmp.ne.s32.totalorder %s2635_s11, %s2129_s6  ;;  %p2133_p8 = scmp.lt.u32.totalorder %s2129_s6, %s2635_s11 }
0x1967   :  { %p2135_p9 = pnand %p2133_p8, %p2130_p7 }
0x1969   :  { %2138 = shalt.err (!%p2135_p9)
}
0x196a   :  { %1708 = dma.vmem_to_hbm [thread:$0]  %s1703_s18, 256, %s2635_s11, [#allocation9], %s2175_s17, %s2175_s17, %s2176_s0  }
0x196b   :  { %v1742_v38 = vld [vmem:[%s2632_s8] ss:$0 sm:$0xff]  ;;  %s2178_s11 = smov [#allocation7]  }
0x196c   :  { %s1678_s8 = sshll.u32 %s2178_s11, 4  ;;  %s1679_s8 = int_to_ptr.vmem [resolvable:$true] %s1678_s8 }
0x196d   :  { %s2139_s7 = scalar_lea.vmem %s1679_s8, 1024  ;;  %p2144_p11 = scmp.lt.s32.totalorder %s1679_s8, %s1679_s8 }
0x196e   :  { %p2140_p10 = scmp.ne.s32.totalorder %s1679_s8, %s2139_s7  ;;  %p2145_p12 = scmp.lt.s32.totalorder %s2139_s7, %s2139_s7 }
0x1970   :  { %p2146_p13 = por %p2145_p12, %p2144_p11 }
0x1972   :  { %p2147_p0 = pnand %p2146_p13, %p2140_p10 }
0x19b2   :  { %v1799_v0 = vpop.f32.mrb[8].mxu0 }
0x19b3   :  { %v1632_v39 = vadd.f32 %v1799_v0, %v1742_v38  ;;  %v1626_v40 = vpop.f32.mrb[9].mxu0 }
0x19b4   :  { %v1627_v56 = vadd.f32 %v1742_v38, %v1626_v40 }
0x19b5   :  { %1666 = vst [vmem:[#allocation7 + $0x8] sm:$0xff] %v1632_v39 }
0x19b6   :  { %1665 = vst [vmem:[#allocation7] sm:$0xff] %v1627_v56  ;;  %v1802_v41 = vpop.f32.mrb[10].mxu0 }
0x19b7   :  { %v1642_v42 = vadd.f32 %v1802_v41, %v1742_v38  ;;  %v1636_v43 = vpop.f32.mrb[11].mxu0 }
0x19b8   :  { %v1637_v44 = vadd.f32 %v1742_v38, %v1636_v43 }
0x19b9   :  { %1668 = vst [vmem:[#allocation7 + $0x18] sm:$0xff] %v1642_v42 }
0x19ba   :  { %1667 = vst [vmem:[#allocation7 + $0x10] sm:$0xff] %v1637_v44  ;;  %v1805_v45 = vpop.f32.mrb[12].mxu0 }
0x19bb   :  { %v1652_v47 = vadd.f32 %v1805_v45, %v1742_v38  ;;  %v1646_v49 = vpop.f32.mrb[13].mxu0 }
0x19bc   :  { %v1647_v53 = vadd.f32 %v1742_v38, %v1646_v49 }
0x19bd   :  { %1670 = vst [vmem:[#allocation7 + $0x28] sm:$0xff] %v1652_v47 }
0x19be   :  { %1669 = vst [vmem:[#allocation7 + $0x20] sm:$0xff] %v1647_v53 }
0x1a23   :  { %v1808_v57 = vpop.f32.mrb[14].mxu0 }
0x1a24   :  { %v1662_v46 = vadd.f32 %v1808_v57, %v1742_v38  ;;  %v1656_v59 = vpop.f32.mrb[15].mxu0 }
0x1a25   :  { %v1657_v61 = vadd.f32 %v1742_v38, %v1656_v59 }
0x1a26   :  { %1672 = vst [vmem:[#allocation7 + $0x38] sm:$0xff] %v1662_v46 }
0x1a27   :  { %1671 = vst [vmem:[#allocation7 + $0x30] sm:$0xff] %v1657_v61 }
0x1a28   :  { %2150 = shalt.err (!%p2147_p0)
}
0x1a29   :  { %s2151_s29 = scalar_lea.hbm %s2633_s9, 1024 }
0x1a2a   :  { %p2152_p1 = scmp.ne.s32.totalorder %s2633_s9, %s2151_s29  ;;  %p2155_p2 = scmp.lt.u32.totalorder %s2151_s29, %s2633_s9 }
0x1a2c   :  { %p2157_p3 = pnand %p2155_p2, %p2152_p1 }
0x1a2e   :  { %2160 = shalt.err (!%p2157_p3)
}
0x1a2f   :  { %1684 = dma.vmem_to_hbm [thread:$0]  %s1679_s8, 1024, %s2633_s9, [#allocation6], %s2175_s17, %s2175_s17, %s2176_s0  }
0x1a30   :  { %2163 = dma.done.wait [#allocation6], 1024  }
0x1a31   :  { %2164 = vsyncadd [#allocation6], 4294966272 }
0x1a32   :  { %2165 = dma.done.wait [#allocation9], 512  }
0x1a33   :  { %2166 = vsyncadd [#allocation9], 4294966784 }
0x1a34   :  { %1718 = vsyncpa [#allocation5], 1 }
0x1a35   :  { %1719 = vsyncpa [#allocation6], 1 }
0x1a36   :  { %1720 = vsyncpa [#allocation9], 1 }

</bundles_post_ra>
